<compile_context>
chip_gen: v7x
topology: tpu7x:2x2x1
jax: 0.10.0
libtpu: 0.0.40
codegen_flags: <defaults>
</compile_context>

<pallas_src>
import functools

import jax
import jax.numpy as jnp
from jax.experimental import pallas as pl
from jax.experimental.pallas import tpu as pltpu


_WEIGHT_KEYS = ("w_q", "b_q", "w_k", "b_k", "w_v", "b_v", "w_o", "b_o",
                "ln1_g", "ln1_b", "w_ff1", "b_ff1", "w_ff2", "b_ff2",
                "ln2_g", "ln2_b", "w_head", "b_head")


# ----------------------------------------------------------------------------
# Fused predictor kernel (one grid step == one batch element, full sequence)
# ----------------------------------------------------------------------------
def _layernorm_f32(x, g, b, eps=1e-5):
    mu = jnp.mean(x, axis=-1, keepdims=True)
    var = jnp.mean(jnp.square(x - mu), axis=-1, keepdims=True)
    return (x - mu) * jax.lax.rsqrt(var + eps) * g + b


def _predictor_kernel(c_ref, wq_ref, bq_ref, wk_ref, bk_ref, wv_ref, bv_ref,
                      wo_ref, bo_ref, ln1g_ref, ln1b_ref,
                      wff1_ref, bff1_ref, wff2_ref, bff2_ref,
                      ln2g_ref, ln2b_ref, whead_ref, bhead_ref,
                      pred_ref, *, n_heads):
    bf16 = jnp.bfloat16
    x32 = c_ref[0].astype(jnp.float32)                       # (S, Dar) f32 (residual)
    xb = x32.astype(bf16)                                    # bf16 MXU input
    S, Dar = x32.shape

    # causal mask, hoisted out of the head loop
    row = jax.lax.broadcasted_iota(jnp.int32, (S, S), 0)
    col = jax.lax.broadcasted_iota(jnp.int32, (S, S), 1)
    causal = col <= row

    # ---- per-head causal self-attention; head-major weights (leading-axis index),
    # ---- out-projection folded into an f32 accumulator (no concat / lane slices) ----
    attn = jnp.zeros((S, Dar), jnp.float32)
    for h in range(n_heads):                                 # statically unrolled
        qh = jnp.dot(xb, wq_ref[h], preferred_element_type=jnp.float32) + bq_ref[h]
        kh = jnp.dot(xb, wk_ref[h], preferred_element_type=jnp.float32) + bk_ref[h]
        vh = jnp.dot(xb, wv_ref[h], preferred_element_type=jnp.float32) + bv_ref[h]
        # 1/sqrt(dh) already folded into wq/bq; contract on dh -> no transpose of kh.
        s = jax.lax.dot_general(qh, kh, (((1,), (1,)), ((), ())),
                                preferred_element_type=jnp.float32)
        s = jnp.where(causal, s, -1e30)
        m = jnp.max(s, axis=-1, keepdims=True)
        p = jnp.exp(s - m)
        p = p * pl.reciprocal(jnp.sum(p, axis=-1, keepdims=True), approx=True)
        attn_h = jnp.dot(p, vh, preferred_element_type=jnp.float32)          # (S, dh)
        attn = attn + jnp.dot(attn_h.astype(bf16), wo_ref[h],
                              preferred_element_type=jnp.float32)            # (S, Dar)
    attn = attn + bo_ref[...]

    # ---- post-norm residual, FFN (ReLU), post-norm residual ------------------
    h1 = _layernorm_f32(x32 + attn, ln1g_ref[...], ln1b_ref[...])
    ff = jnp.dot(h1.astype(bf16), wff1_ref[...],
                 preferred_element_type=jnp.float32) + bff1_ref[...]
    ff = jnp.maximum(ff, 0.0)
    ff = jnp.dot(ff.astype(bf16), wff2_ref[...],
                 preferred_element_type=jnp.float32) + bff2_ref[...]
    h2 = _layernorm_f32(h1 + ff, ln2g_ref[...], ln2b_ref[...]).astype(bf16)

    # ---- ALL K head projections in one MXU op + one lane-dense store ---------
    # (1/Denc of `.mean(dim=3)` pre-folded into whead/bhead in prepare_params)
    pred = jnp.dot(h2, whead_ref[...], preferred_element_type=jnp.float32) + bhead_ref[...]
    pred_ref[0] = pred.astype(pred_ref.dtype)                # (S, K*Denc)


def predictor_forward(c, wp, n_heads):
    """c: (B, S, Dar) -> per-head predictions (B, S, K*Denc) bf16 (pre-scaled by 1/Denc)."""
    B, S, Dar = c.shape
    KD = wp["w_head"].shape[1]
    weights = [wp[k] for k in _WEIGHT_KEYS]
    kernel = functools.partial(_predictor_kernel, n_heads=n_heads)

    def const_spec(a):
        nd = a.ndim
        return pl.BlockSpec(a.shape, lambda b, _n=nd: (0,) * _n)

    # Constant-index weight specs stay resident across the batch grid (no re-DMA).
    # TODO(synk): on v7x (64 MiB VMEM) consider pipeline_mode=pl.Buffered(1) on the
    # weight specs to halve their resident footprint (they never change across grid steps).
    in_specs = [pl.BlockSpec((1, S, Dar), lambda b: (b, 0, 0))]
    in_specs += [const_spec(w) for w in weights]

    return pl.pallas_call(
        kernel,
        out_shape=jax.ShapeDtypeStruct((B, S, KD), jnp.bfloat16),
        grid=(B,),
        in_specs=in_specs,
        out_specs=pl.BlockSpec((1, S, KD), lambda b: (b, 0, 0)),
        compiler_params=pltpu.CompilerParams(dimension_semantics=("parallel",)),
    )(c, *weights)


# ----------------------------------------------------------------------------
# Scoring kernel: out[k, b, n, s] = sum_d pred[b, s, k*Denc+d] * cand[k, b, n, s, d]
# (the 1/Denc mean scale is already folded into pred)
# ----------------------------------------------------------------------------
def _score_kernel(p_ref, c_ref, o_ref, *, n_tile):
    pred = p_ref[0].astype(jnp.float32)                      # (S, Denc) f32, hoisted
    rows = []
    for n in range(n_tile):                                  # per-candidate f32 MAC:
        cn = c_ref[0, 0, n].astype(jnp.float32)              # only (S, Denc) f32 live,
        rows.append(jnp.sum(cn * pred, axis=-1)[None, :])    # never a full-block f32 copy
    # single lane-dense store of the flattened (n-major, s-minor) scores
    o_ref[0, 0, 0] = jnp.concatenate(rows, axis=1)           # (1, n_tile*S)


def _pick_n_tile(n, s, denc, itemsize, target_bytes=2 << 20):
    best = 1
    for t in range(1, n + 1):
        if n % t == 0 and t * s * denc * itemsize <= target_bytes:
            best = t
    return best


def score_heads(pred_bsd, candidates, n_tile=None):
    """pred_bsd: (B, S, K*Denc) bf16; candidates: (K, B, N, S, Denc) -> (K, B, N, S) f32."""
    B, S, KD = pred_bsd.shape
    K, Bc, N, Sc, Denc = candidates.shape
    assert (B, S) == (Bc, Sc) and K * Denc == KD
    # The pred BlockSpec picks the k-th Denc lane block out of K*Denc.
    # TODO(synk): pad dimOutputEncoder to a multiple of 128 in the wrapper if it is not.
    assert K == 1 or Denc % 128 == 0, "dimOutputEncoder must be a multiple of 128"
    if n_tile is None:
        n_tile = _pick_n_tile(N, S, Denc, candidates.dtype.itemsize)
    assert N % n_tile == 0
    nb = N // n_tile
    kernel = functools.partial(_score_kernel, n_tile=n_tile)

    out = pl.pallas_call(
        kernel,
        out_shape=jax.ShapeDtypeStruct((K, B, nb, 1, n_tile * S), jnp.float32),
        grid=(K, B, nb),
        in_specs=[
            # pred block constant across the (innermost) N-tile axis -> stays resident
            pl.BlockSpec((1, S, Denc), lambda k, b, n: (b, 0, k)),
            pl.BlockSpec((1, 1, n_tile, S, Denc), lambda k, b, n: (k, b, n, 0, 0)),
        ],
        out_specs=pl.BlockSpec((1, 1, 1, 1, n_tile * S), lambda k, b, n: (k, b, n, 0, 0)),
        compiler_params=pltpu.CompilerParams(
            dimension_semantics=("parallel", "parallel", "parallel")),
    )(pred_bsd, candidates)
    return out.reshape(K, B, N, S)


# ----------------------------------------------------------------------------
# Parameters: PyTorch-like init + ONE-TIME transform into kernel-ready layout
# ----------------------------------------------------------------------------
def init_params(key, dim_ar, dim_enc, n_predicts, ffn_hidden):
    ks = jax.random.split(key, 8)
    s = 0.02

    def nrm(k, shape):
        return (s * jax.random.normal(k, shape)).astype(jnp.float32)

    return {
        "w_qkv": nrm(ks[0], (dim_ar, 3 * dim_ar)),
        "b_qkv": jnp.zeros((3 * dim_ar,), jnp.float32),
        "w_o": nrm(ks[1], (dim_ar, dim_ar)),
        "b_o": jnp.zeros((dim_ar,), jnp.float32),
        "ln1_g": jnp.ones((dim_ar,), jnp.float32),
        "ln1_b": jnp.zeros((dim_ar,), jnp.float32),
        "w_ff1": nrm(ks[2], (dim_ar, ffn_hidden)),
        "b_ff1": jnp.zeros((ffn_hidden,), jnp.float32),
        "w_ff2": nrm(ks[3], (ffn_hidden, dim_ar)),
        "b_ff2": jnp.zeros((dim_ar,), jnp.float32),
        "ln2_g": jnp.ones((dim_ar,), jnp.float32),
        "ln2_b": jnp.zeros((dim_ar,), jnp.float32),
        "w_head": nrm(ks[4], (dim_ar, n_predicts * dim_enc)),
        "b_head": jnp.zeros((n_predicts * dim_enc,), jnp.float32),
    }


def prepare_params(params, n_predicts):
    """One-time transform: head-major layouts, bf16 MXU weights, f32 biases/LN params,
    1/sqrt(dh) folded into Q, 1/Denc (of .mean(dim=3)) folded into the head projection."""
    w_qkv = params["w_qkv"]
    dar = w_qkv.shape[0]
    k = n_predicts
    assert dar % k == 0, "dimOutputAR must be divisible by nPredicts (nHeads)"
    dh = dar // k
    kd = params["w_head"].shape[1]
    denc = kd // k
    scale = 1.0 / float(dh) ** 0.5
    inv_denc = 1.0 / float(denc)
    bf, f32 = jnp.bfloat16, jnp.float32

    def hm_w(w):   # (Dar, Dar) column-sliced per head -> (K, Dar, dh)
        return w.reshape(dar, k, dh).transpose(1, 0, 2)

    def hm_b(b):   # (Dar,) -> (K, 1, dh)
        return b.reshape(k, 1, dh)

    wq, wk, wv = w_qkv[:, :dar], w_qkv[:, dar:2 * dar], w_qkv[:, 2 * dar:]
    bq, bk, bv = (params["b_qkv"][:dar], params["b_qkv"][dar:2 * dar],
                  params["b_qkv"][2 * dar:])
    return {
        "w_q": (hm_w(wq) * scale).astype(bf),
        "b_q": (hm_b(bq) * scale).astype(f32),
        "w_k": hm_w(wk).astype(bf),
        "b_k": hm_b(bk).astype(f32),
        "w_v": hm_w(wv).astype(bf),
        "b_v": hm_b(bv).astype(f32),
        "w_o": params["w_o"].reshape(k, dh, dar).astype(bf),      # head-major rows
        "b_o": params["b_o"].reshape(1, dar).astype(f32),
        "ln1_g": params["ln1_g"].reshape(1, dar).astype(f32),
        "ln1_b": params["ln1_b"].reshape(1, dar).astype(f32),
        "w_ff1": params["w_ff1"].astype(bf),
        "b_ff1": params["b_ff1"].reshape(1, -1).astype(f32),
        "w_ff2": params["w_ff2"].astype(bf),
        "b_ff2": params["b_ff2"].reshape(1, dar).astype(f32),
        "ln2_g": params["ln2_g"].reshape(1, dar).astype(f32),
        "ln2_b": params["ln2_b"].reshape(1, dar).astype(f32),
        "w_head": (params["w_head"] * inv_denc).astype(bf),       # (Dar, K*Denc), fused
        "b_head": (params["b_head"] * inv_denc).reshape(1, kd).astype(f32),
    }


def multi_head_prediction_forward(prepared, c, candidates):
    """Pallas implementation of MultiHeadPredictionNetwork.forward.

    c          : (B, S, dimOutputAR)
    candidates : (K, B, N, S, dimOutputEncoder)  (stacked list of length K = nPredicts)
    returns    : list of K arrays of shape (B, N, S)
    """
    K = candidates.shape[0]
    assert prepared["w_head"].shape[1] == K * candidates.shape[-1]
    # dropout=False in the reference config -> identity (skipped)
    pred = predictor_forward(c, prepared, K)          # (B, S, K*Denc) bf16
    scores = score_heads(pred, candidates)            # (K, B, N, S) f32
    return [scores[i] for i in range(K)]


# ----------------------------------------------------------------------------
if __name__ == "__main__":
    # small shapes consistent with the module (feature dims kept 128-friendly)
    B, S = 2, 8
    dimOutputAR = 64
    dimOutputEncoder = 128
    nPredicts = 4          # K heads
    N = 4                  # candidates (negatives + positive) per step
    ffn_hidden = 128

    key = jax.random.PRNGKey(0)
    k_par, k_c, k_cand = jax.random.split(key, 3)

    params = init_params(k_par, dimOutputAR, dimOutputEncoder, nPredicts, ffn_hidden)
    prepared = prepare_params(params, nPredicts)
    c = jax.random.normal(k_c, (B, S, dimOutputAR), dtype=jnp.float32)
    candidates = jax.random.normal(
        k_cand, (nPredicts, B, N, S, dimOutputEncoder), dtype=jnp.float32
    )

    fwd = jax.jit(multi_head_prediction_forward)
    outs = fwd(prepared, c, candidates)
    outs = [jax.block_until_ready(o) for o in outs]

    assert len(outs) == nPredicts
    for o in outs:
        assert o.shape == (B, N, S), o.shape
        assert bool(jnp.all(jnp.isfinite(o)))

    # sanity: scoring stage vs a pure-JAX reference on the kernel's own predictions
    pred = jax.jit(functools.partial(predictor_forward, n_heads=nPredicts))(c, prepared)
    pred = jax.block_until_ready(pred).astype(jnp.float32)    # (B, S, K*Denc)
    for k in range(nPredicts):
        lo = k * dimOutputEncoder
        ref = jnp.sum(pred[:, None, :, lo:lo + dimOutputEncoder] * candidates[k], axis=-1)
        err = float(jnp.max(jnp.abs(outs[k] - ref)))
        assert err < 1e-3, f"score mismatch head {k}: {err}"

    print("KERNEL_OK")
</pallas_src>

<mosaic_0001>
module attributes {stable_mosaic.version = 11 : i64} {
  func.func @_score_kernel(%arg0: i32, %arg1: i32, %arg2: i32, %arg3: memref<1x8x128xbf16, #tpu.memory_space<vmem>>, %arg4: memref<1x1x4x8x128xf32, #tpu.memory_space<vmem>>, %arg5: memref<1x1x1x1x32xf32, #tpu.memory_space<vmem>>) attributes {dimension_semantics = [#tpu.dimension_semantics<parallel>, #tpu.dimension_semantics<parallel>, #tpu.dimension_semantics<parallel>], iteration_bounds = array<i64: 4, 2, 1>, scalar_prefetch = 0 : i64, scratch_operands = 0 : i64, tpu.core_type = #tpu.core_type<tc>, window_params = [{transform_indices = @transform_0, window_bounds = array<i64: 1, 8, 128>}, {transform_indices = @transform_1, window_bounds = array<i64: 1, 1, 4, 8, 128>}, {transform_indices = @transform_2, window_bounds = array<i64: 1, 1, 1, 1, 32>}]} {
    %c0 = arith.constant 0 : index
    %c0_0 = arith.constant 0 : index
    %c0_1 = arith.constant 0 : index
    %0 = vector.load %arg3[%c0, %c0_0, %c0_1] : memref<1x8x128xbf16, #tpu.memory_space<vmem>>, vector<1x8x128xbf16>
    %1 = vector.shape_cast %0 : vector<1x8x128xbf16> to vector<8x128xbf16>
    %2 = arith.extf %1 : vector<8x128xbf16> to vector<8x128xf32>
    %c0_2 = arith.constant 0 : index
    %c0_3 = arith.constant 0 : index
    %c0_4 = arith.constant 0 : index
    %c0_5 = arith.constant 0 : index
    %c0_6 = arith.constant 0 : index
    %3 = vector.load %arg4[%c0_2, %c0_3, %c0_4, %c0_5, %c0_6] : memref<1x1x4x8x128xf32, #tpu.memory_space<vmem>>, vector<1x1x1x8x128xf32>
    %4 = vector.shape_cast %3 : vector<1x1x1x8x128xf32> to vector<8x128xf32>
    %5 = arith.mulf %4, %2 : vector<8x128xf32>
    %cst = arith.constant dense<0.000000e+00> : vector<8xf32>
    %6 = vector.multi_reduction <add>, %5, %cst [1] : vector<8x128xf32> to vector<8xf32>
    %7 = vector.shape_cast %6 : vector<8xf32> to vector<1x8xf32>
    %c0_7 = arith.constant 0 : index
    %c0_8 = arith.constant 0 : index
    %c1 = arith.constant 1 : index
    %c0_9 = arith.constant 0 : index
    %c0_10 = arith.constant 0 : index
    %8 = vector.load %arg4[%c0_7, %c0_8, %c1, %c0_9, %c0_10] : memref<1x1x4x8x128xf32, #tpu.memory_space<vmem>>, vector<1x1x1x8x128xf32>
    %9 = vector.shape_cast %8 : vector<1x1x1x8x128xf32> to vector<8x128xf32>
    %10 = arith.mulf %9, %2 : vector<8x128xf32>
    %cst_11 = arith.constant dense<0.000000e+00> : vector<8xf32>
    %11 = vector.multi_reduction <add>, %10, %cst_11 [1] : vector<8x128xf32> to vector<8xf32>
    %12 = vector.shape_cast %11 : vector<8xf32> to vector<1x8xf32>
    %c0_12 = arith.constant 0 : index
    %c0_13 = arith.constant 0 : index
    %c2 = arith.constant 2 : index
    %c0_14 = arith.constant 0 : index
    %c0_15 = arith.constant 0 : index
    %13 = vector.load %arg4[%c0_12, %c0_13, %c2, %c0_14, %c0_15] : memref<1x1x4x8x128xf32, #tpu.memory_space<vmem>>, vector<1x1x1x8x128xf32>
    %14 = vector.shape_cast %13 : vector<1x1x1x8x128xf32> to vector<8x128xf32>
    %15 = arith.mulf %14, %2 : vector<8x128xf32>
    %cst_16 = arith.constant dense<0.000000e+00> : vector<8xf32>
    %16 = vector.multi_reduction <add>, %15, %cst_16 [1] : vector<8x128xf32> to vector<8xf32>
    %17 = vector.shape_cast %16 : vector<8xf32> to vector<1x8xf32>
    %c0_17 = arith.constant 0 : index
    %c0_18 = arith.constant 0 : index
    %c3 = arith.constant 3 : index
    %c0_19 = arith.constant 0 : index
    %c0_20 = arith.constant 0 : index
    %18 = vector.load %arg4[%c0_17, %c0_18, %c3, %c0_19, %c0_20] : memref<1x1x4x8x128xf32, #tpu.memory_space<vmem>>, vector<1x1x1x8x128xf32>
    %19 = vector.shape_cast %18 : vector<1x1x1x8x128xf32> to vector<8x128xf32>
    %20 = arith.mulf %19, %2 : vector<8x128xf32>
    %cst_21 = arith.constant dense<0.000000e+00> : vector<8xf32>
    %21 = vector.multi_reduction <add>, %20, %cst_21 [1] : vector<8x128xf32> to vector<8xf32>
    %22 = vector.shape_cast %21 : vector<8xf32> to vector<1x8xf32>
    %23 = tpu.concatenate %7, %12, %17, %22 in 1 : vector<1x8xf32>, vector<1x8xf32>, vector<1x8xf32>, vector<1x8xf32> -> vector<1x32xf32>
    %c0_22 = arith.constant 0 : index
    %c0_23 = arith.constant 0 : index
    %c0_24 = arith.constant 0 : index
    %c0_25 = arith.constant 0 : index
    %c0_26 = arith.constant 0 : index
    %24 = vector.load %arg5[%c0_22, %c0_23, %c0_24, %c0_25, %c0_26] : memref<1x1x1x1x32xf32, #tpu.memory_space<vmem>>, vector<1x1x1x1x32xf32>
    %25 = vector.shape_cast %24 : vector<1x1x1x1x32xf32> to vector<1x32xf32>
    %26 = vector.shape_cast %23 : vector<1x32xf32> to vector<1x1x1x1x32xf32>
    tpu.vector_store %arg5[%c0_22, %c0_23, %c0_24, %c0_25, %c0_26], %26 {strides = array<i32>} : memref<1x1x1x1x32xf32, #tpu.memory_space<vmem>>, vector<1x1x1x1x32xf32>,
    return
  }
  func.func @transform_0(%arg0: i32, %arg1: i32, %arg2: i32) -> (i32, i32, i32) {
    %c0_i32 = arith.constant 0 : i32
    %c0_i32_0 = arith.constant 0 : i32
    return %arg1, %c0_i32, %arg0 : i32, i32, i32
  }
  func.func @transform_1(%arg0: i32, %arg1: i32, %arg2: i32) -> (i32, i32, i32, i32, i32) {
    %c0_i32 = arith.constant 0 : i32
    %c0_i32_0 = arith.constant 0 : i32
    %c0_i32_1 = arith.constant 0 : i32
    return %arg0, %arg1, %arg2, %c0_i32, %c0_i32_0 : i32, i32, i32, i32, i32
  }
  func.func @transform_2(%arg0: i32, %arg1: i32, %arg2: i32) -> (i32, i32, i32, i32, i32) {
    %c0_i32 = arith.constant 0 : i32
    %c0_i32_0 = arith.constant 0 : i32
    %c0_i32_1 = arith.constant 0 : i32
    return %arg0, %arg1, %arg2, %c0_i32, %c0_i32_0 : i32, i32, i32, i32, i32
  }
}

module attributes {stable_mosaic.version = 11 : i64} {
  func.func @_predictor_kernel(%arg0: i32, %arg1: memref<1x8x64xf32, #tpu.memory_space<vmem>>, %arg2: memref<4x64x16xbf16, #tpu.memory_space<vmem>>, %arg3: memref<4x1x16xf32, #tpu.memory_space<vmem>>, %arg4: memref<4x64x16xbf16, #tpu.memory_space<vmem>>, %arg5: memref<4x1x16xf32, #tpu.memory_space<vmem>>, %arg6: memref<4x64x16xbf16, #tpu.memory_space<vmem>>, %arg7: memref<4x1x16xf32, #tpu.memory_space<vmem>>, %arg8: memref<4x16x64xbf16, #tpu.memory_space<vmem>>, %arg9: memref<1x64xf32, #tpu.memory_space<vmem>>, %arg10: memref<1x64xf32, #tpu.memory_space<vmem>>, %arg11: memref<1x64xf32, #tpu.memory_space<vmem>>, %arg12: memref<64x128xbf16, #tpu.memory_space<vmem>>, %arg13: memref<1x128xf32, #tpu.memory_space<vmem>>, %arg14: memref<128x64xbf16, #tpu.memory_space<vmem>>, %arg15: memref<1x64xf32, #tpu.memory_space<vmem>>, %arg16: memref<1x64xf32, #tpu.memory_space<vmem>>, %arg17: memref<1x64xf32, #tpu.memory_space<vmem>>, %arg18: memref<64x512xbf16, #tpu.memory_space<vmem>>, %arg19: memref<1x512xf32, #tpu.memory_space<vmem>>, %arg20: memref<1x8x512xbf16, #tpu.memory_space<vmem>>) attributes {dimension_semantics = [#tpu.dimension_semantics<parallel>], iteration_bounds = array<i64: 2>, scalar_prefetch = 0 : i64, scratch_operands = 0 : i64, tpu.core_type = #tpu.core_type<tc>, window_params = [{transform_indices = @transform_0, window_bounds = array<i64: 1, 8, 64>}, {pipeline_mode = #tpu.pipeline_mode<synchronous>, transform_indices = @transform_1, window_bounds = array<i64: 4, 64, 16>}, {pipeline_mode = #tpu.pipeline_mode<synchronous>, transform_indices = @transform_2, window_bounds = array<i64: 4, 1, 16>}, {pipeline_mode = #tpu.pipeline_mode<synchronous>, transform_indices = @transform_3, window_bounds = array<i64: 4, 64, 16>}, {pipeline_mode = #tpu.pipeline_mode<synchronous>, transform_indices = @transform_4, window_bounds = array<i64: 4, 1, 16>}, {pipeline_mode = #tpu.pipeline_mode<synchronous>, transform_indices = @transform_5, window_bounds = array<i64: 4, 64, 16>}, {pipeline_mode = #tpu.pipeline_mode<synchronous>, transform_indices = @transform_6, window_bounds = array<i64: 4, 1, 16>}, {pipeline_mode = #tpu.pipeline_mode<synchronous>, transform_indices = @transform_7, window_bounds = array<i64: 4, 16, 64>}, {pipeline_mode = #tpu.pipeline_mode<synchronous>, transform_indices = @transform_8, window_bounds = array<i64: 1, 64>}, {pipeline_mode = #tpu.pipeline_mode<synchronous>, transform_indices = @transform_9, window_bounds = array<i64: 1, 64>}, {pipeline_mode = #tpu.pipeline_mode<synchronous>, transform_indices = @transform_10, window_bounds = array<i64: 1, 64>}, {pipeline_mode = #tpu.pipeline_mode<synchronous>, transform_indices = @transform_11, window_bounds = array<i64: 64, 128>}, {pipeline_mode = #tpu.pipeline_mode<synchronous>, transform_indices = @transform_12, window_bounds = array<i64: 1, 128>}, {pipeline_mode = #tpu.pipeline_mode<synchronous>, transform_indices = @transform_13, window_bounds = array<i64: 128, 64>}, {pipeline_mode = #tpu.pipeline_mode<synchronous>, transform_indices = @transform_14, window_bounds = array<i64: 1, 64>}, {pipeline_mode = #tpu.pipeline_mode<synchronous>, transform_indices = @transform_15, window_bounds = array<i64: 1, 64>}, {pipeline_mode = #tpu.pipeline_mode<synchronous>, transform_indices = @transform_16, window_bounds = array<i64: 1, 64>}, {pipeline_mode = #tpu.pipeline_mode<synchronous>, transform_indices = @transform_17, window_bounds = array<i64: 64, 512>}, {pipeline_mode = #tpu.pipeline_mode<synchronous>, transform_indices = @transform_18, window_bounds = array<i64: 1, 512>}, {transform_indices = @transform_19, window_bounds = array<i64: 1, 8, 512>}]} {
    %c0 = arith.constant 0 : index
    %c0_0 = arith.constant 0 : index
    %c0_1 = arith.constant 0 : index
    %0 = vector.load %arg1[%c0, %c0_0, %c0_1] : memref<1x8x64xf32, #tpu.memory_space<vmem>>, vector<1x8x64xf32>
    %1 = vector.shape_cast %0 : vector<1x8x64xf32> to vector<8x64xf32>
    %2 = arith.truncf %1 : vector<8x64xf32> to vector<8x64xbf16>
    %3 = tpu.iota {dimensions = array<i32: 0>} : vector<8x8xi32>
    %4 = tpu.iota {dimensions = array<i32: 1>} : vector<8x8xi32>
    %5 = arith.cmpi sle, %4, %3 : vector<8x8xi32>
    %cst = arith.constant 0.000000e+00 : f32
    %6 = vector.broadcast %cst : f32 to vector<8x64xf32>
    %c0_2 = arith.constant 0 : index
    %c0_3 = arith.constant 0 : index
    %c0_4 = arith.constant 0 : index
    %7 = vector.load %arg2[%c0_2, %c0_3, %c0_4] : memref<4x64x16xbf16, #tpu.memory_space<vmem>>, vector<1x64x16xbf16>
    %8 = vector.shape_cast %7 : vector<1x64x16xbf16> to vector<64x16xbf16>
    %cst_5 = arith.constant dense<0.000000e+00> : vector<8x16xf32>
    %9 = tpu.matmul %2, %8, %cst_5 {dimension_numbers = #tpu.dot_dimension_numbers<[1], [0], [0], [1], [0, 0, 1, 1], [], []>} : vector<8x64xbf16>, vector<64x16xbf16>, vector<8x16xf32> -> vector<8x16xf32>
    %c0_6 = arith.constant 0 : index
    %c0_7 = arith.constant 0 : index
    %c0_8 = arith.constant 0 : index
    %10 = vector.load %arg3[%c0_6, %c0_7, %c0_8] : memref<4x1x16xf32, #tpu.memory_space<vmem>>, vector<1x1x16xf32>
    %11 = vector.shape_cast %10 : vector<1x1x16xf32> to vector<1x16xf32>
    %12 = vector.broadcast %11 : vector<1x16xf32> to vector<8x16xf32>
    %13 = arith.addf %9, %12 : vector<8x16xf32>
    %c0_9 = arith.constant 0 : index
    %c0_10 = arith.constant 0 : index
    %c0_11 = arith.constant 0 : index
    %14 = vector.load %arg4[%c0_9, %c0_10, %c0_11] : memref<4x64x16xbf16, #tpu.memory_space<vmem>>, vector<1x64x16xbf16>
    %15 = vector.shape_cast %14 : vector<1x64x16xbf16> to vector<64x16xbf16>
    %cst_12 = arith.constant dense<0.000000e+00> : vector<8x16xf32>
    %16 = tpu.matmul %2, %15, %cst_12 {dimension_numbers = #tpu.dot_dimension_numbers<[1], [0], [0], [1], [0, 0, 1, 1], [], []>} : vector<8x64xbf16>, vector<64x16xbf16>, vector<8x16xf32> -> vector<8x16xf32>
    %c0_13 = arith.constant 0 : index
    %c0_14 = arith.constant 0 : index
    %c0_15 = arith.constant 0 : index
    %17 = vector.load %arg5[%c0_13, %c0_14, %c0_15] : memref<4x1x16xf32, #tpu.memory_space<vmem>>, vector<1x1x16xf32>
    %18 = vector.shape_cast %17 : vector<1x1x16xf32> to vector<1x16xf32>
    %19 = vector.broadcast %18 : vector<1x16xf32> to vector<8x16xf32>
    %20 = arith.addf %16, %19 : vector<8x16xf32>
    %c0_16 = arith.constant 0 : index
    %c0_17 = arith.constant 0 : index
    %c0_18 = arith.constant 0 : index
    %21 = vector.load %arg6[%c0_16, %c0_17, %c0_18] : memref<4x64x16xbf16, #tpu.memory_space<vmem>>, vector<1x64x16xbf16>
    %22 = vector.shape_cast %21 : vector<1x64x16xbf16> to vector<64x16xbf16>
    %cst_19 = arith.constant dense<0.000000e+00> : vector<8x16xf32>
    %23 = tpu.matmul %2, %22, %cst_19 {dimension_numbers = #tpu.dot_dimension_numbers<[1], [0], [0], [1], [0, 0, 1, 1], [], []>} : vector<8x64xbf16>, vector<64x16xbf16>, vector<8x16xf32> -> vector<8x16xf32>
    %c0_20 = arith.constant 0 : index
    %c0_21 = arith.constant 0 : index
    %c0_22 = arith.constant 0 : index
    %24 = vector.load %arg7[%c0_20, %c0_21, %c0_22] : memref<4x1x16xf32, #tpu.memory_space<vmem>>, vector<1x1x16xf32>
    %25 = vector.shape_cast %24 : vector<1x1x16xf32> to vector<1x16xf32>
    %26 = vector.broadcast %25 : vector<1x16xf32> to vector<8x16xf32>
    %27 = arith.addf %23, %26 : vector<8x16xf32>
    %cst_23 = arith.constant dense<0.000000e+00> : vector<8x8xf32>
    %28 = tpu.matmul %13, %20, %cst_23 {dimension_numbers = #tpu.dot_dimension_numbers<[1], [1], [0], [0], [0, 0, 1, 0], [], []>} : vector<8x16xf32>, vector<8x16xf32>, vector<8x8xf32> -> vector<8x8xf32>
    %cst_24 = arith.constant -1.000000e+30 : f32
    %29 = vector.broadcast %cst_24 : f32 to vector<8x8xf32>
    %30 = arith.select %5, %28, %29 : vector<8x8xi1>, vector<8x8xf32>
    %cst_25 = arith.constant dense<0xFF800000> : vector<8xf32>
    %31 = vector.multi_reduction <maximumf>, %30, %cst_25 [1] : vector<8x8xf32> to vector<8xf32>
    %32 = vector.shape_cast %31 : vector<8xf32> to vector<8x1xf32>
    %33 = vector.broadcast %32 : vector<8x1xf32> to vector<8x8xf32>
    %34 = arith.subf %30, %33 : vector<8x8xf32>
    %35 = math.exp %34 : vector<8x8xf32>
    %cst_26 = arith.constant dense<0.000000e+00> : vector<8xf32>
    %36 = vector.multi_reduction <add>, %35, %cst_26 [1] : vector<8x8xf32> to vector<8xf32>
    %37 = vector.shape_cast %36 : vector<8xf32> to vector<8x1xf32>
    %38 = tpu.reciprocal %37 {approx = true} : vector<8x1xf32> -> vector<8x1xf32>
    %39 = vector.broadcast %38 : vector<8x1xf32> to vector<8x8xf32>
    %40 = arith.mulf %35, %39 : vector<8x8xf32>
    %cst_27 = arith.constant dense<0.000000e+00> : vector<8x16xf32>
    %41 = tpu.matmul %40, %27, %cst_27 {dimension_numbers = #tpu.dot_dimension_numbers<[1], [0], [0], [1], [0, 0, 1, 1], [], []>} : vector<8x8xf32>, vector<8x16xf32>, vector<8x16xf32> -> vector<8x16xf32>
    %42 = arith.truncf %41 : vector<8x16xf32> to vector<8x16xbf16>
    %c0_28 = arith.constant 0 : index
    %c0_29 = arith.constant 0 : index
    %c0_30 = arith.constant 0 : index
    %43 = vector.load %arg8[%c0_28, %c0_29, %c0_30] : memref<4x16x64xbf16, #tpu.memory_space<vmem>>, vector<1x16x64xbf16>
    %44 = vector.shape_cast %43 : vector<1x16x64xbf16> to vector<16x64xbf16>
    %cst_31 = arith.constant dense<0.000000e+00> : vector<8x64xf32>
    %45 = tpu.matmul %42, %44, %cst_31 {dimension_numbers = #tpu.dot_dimension_numbers<[1], [0], [0], [1], [0, 0, 1, 1], [], []>} : vector<8x16xbf16>, vector<16x64xbf16>, vector<8x64xf32> -> vector<8x64xf32>
    %46 = arith.addf %6, %45 : vector<8x64xf32>
    %c1 = arith.constant 1 : index
    %c0_32 = arith.constant 0 : index
    %c0_33 = arith.constant 0 : index
    %47 = vector.load %arg2[%c1, %c0_32, %c0_33] : memref<4x64x16xbf16, #tpu.memory_space<vmem>>, vector<1x64x16xbf16>
    %48 = vector.shape_cast %47 : vector<1x64x16xbf16> to vector<64x16xbf16>
    %cst_34 = arith.constant dense<0.000000e+00> : vector<8x16xf32>
    %49 = tpu.matmul %2, %48, %cst_34 {dimension_numbers = #tpu.dot_dimension_numbers<[1], [0], [0], [1], [0, 0, 1, 1], [], []>} : vector<8x64xbf16>, vector<64x16xbf16>, vector<8x16xf32> -> vector<8x16xf32>
    %c1_35 = arith.constant 1 : index
    %c0_36 = arith.constant 0 : index
    %c0_37 = arith.constant 0 : index
    %50 = vector.load %arg3[%c1_35, %c0_36, %c0_37] : memref<4x1x16xf32, #tpu.memory_space<vmem>>, vector<1x1x16xf32>
    %51 = vector.shape_cast %50 : vector<1x1x16xf32> to vector<1x16xf32>
    %52 = vector.broadcast %51 : vector<1x16xf32> to vector<8x16xf32>
    %53 = arith.addf %49, %52 : vector<8x16xf32>
    %c1_38 = arith.constant 1 : index
    %c0_39 = arith.constant 0 : index
    %c0_40 = arith.constant 0 : index
    %54 = vector.load %arg4[%c1_38, %c0_39, %c0_40] : memref<4x64x16xbf16, #tpu.memory_space<vmem>>, vector<1x64x16xbf16>
    %55 = vector.shape_cast %54 : vector<1x64x16xbf16> to vector<64x16xbf16>
    %cst_41 = arith.constant dense<0.000000e+00> : vector<8x16xf32>
    %56 = tpu.matmul %2, %55, %cst_41 {dimension_numbers = #tpu.dot_dimension_numbers<[1], [0], [0], [1], [0, 0, 1, 1], [], []>} : vector<8x64xbf16>, vector<64x16xbf16>, vector<8x16xf32> -> vector<8x16xf32>
    %c1_42 = arith.constant 1 : index
    %c0_43 = arith.constant 0 : index
    %c0_44 = arith.constant 0 : index
    %57 = vector.load %arg5[%c1_42, %c0_43, %c0_44] : memref<4x1x16xf32, #tpu.memory_space<vmem>>, vector<1x1x16xf32>
    %58 = vector.shape_cast %57 : vector<1x1x16xf32> to vector<1x16xf32>
    %59 = vector.broadcast %58 : vector<1x16xf32> to vector<8x16xf32>
    %60 = arith.addf %56, %59 : vector<8x16xf32>
    %c1_45 = arith.constant 1 : index
    %c0_46 = arith.constant 0 : index
    %c0_47 = arith.constant 0 : index
    %61 = vector.load %arg6[%c1_45, %c0_46, %c0_47] : memref<4x64x16xbf16, #tpu.memory_space<vmem>>, vector<1x64x16xbf16>
    %62 = vector.shape_cast %61 : vector<1x64x16xbf16> to vector<64x16xbf16>
    %cst_48 = arith.constant dense<0.000000e+00> : vector<8x16xf32>
    %63 = tpu.matmul %2, %62, %cst_48 {dimension_numbers = #tpu.dot_dimension_numbers<[1], [0], [0], [1], [0, 0, 1, 1], [], []>} : vector<8x64xbf16>, vector<64x16xbf16>, vector<8x16xf32> -> vector<8x16xf32>
    %c1_49 = arith.constant 1 : index
    %c0_50 = arith.constant 0 : index
    %c0_51 = arith.constant 0 : index
    %64 = vector.load %arg7[%c1_49, %c0_50, %c0_51] : memref<4x1x16xf32, #tpu.memory_space<vmem>>, vector<1x1x16xf32>
    %65 = vector.shape_cast %64 : vector<1x1x16xf32> to vector<1x16xf32>
    %66 = vector.broadcast %65 : vector<1x16xf32> to vector<8x16xf32>
    %67 = arith.addf %63, %66 : vector<8x16xf32>
    %cst_52 = arith.constant dense<0.000000e+00> : vector<8x8xf32>
    %68 = tpu.matmul %53, %60, %cst_52 {dimension_numbers = #tpu.dot_dimension_numbers<[1], [1], [0], [0], [0, 0, 1, 0], [], []>} : vector<8x16xf32>, vector<8x16xf32>, vector<8x8xf32> -> vector<8x8xf32>
    %cst_53 = arith.constant -1.000000e+30 : f32
    %69 = vector.broadcast %cst_53 : f32 to vector<8x8xf32>
    %70 = arith.select %5, %68, %69 : vector<8x8xi1>, vector<8x8xf32>
    %cst_54 = arith.constant dense<0xFF800000> : vector<8xf32>
    %71 = vector.multi_reduction <maximumf>, %70, %cst_54 [1] : vector<8x8xf32> to vector<8xf32>
    %72 = vector.shape_cast %71 : vector<8xf32> to vector<8x1xf32>
    %73 = vector.broadcast %72 : vector<8x1xf32> to vector<8x8xf32>
    %74 = arith.subf %70, %73 : vector<8x8xf32>
    %75 = math.exp %74 : vector<8x8xf32>
    %cst_55 = arith.constant dense<0.000000e+00> : vector<8xf32>
    %76 = vector.multi_reduction <add>, %75, %cst_55 [1] : vector<8x8xf32> to vector<8xf32>
    %77 = vector.shape_cast %76 : vector<8xf32> to vector<8x1xf32>
    %78 = tpu.reciprocal %77 {approx = true} : vector<8x1xf32> -> vector<8x1xf32>
    %79 = vector.broadcast %78 : vector<8x1xf32> to vector<8x8xf32>
    %80 = arith.mulf %75, %79 : vector<8x8xf32>
    %cst_56 = arith.constant dense<0.000000e+00> : vector<8x16xf32>
    %81 = tpu.matmul %80, %67, %cst_56 {dimension_numbers = #tpu.dot_dimension_numbers<[1], [0], [0], [1], [0, 0, 1, 1], [], []>} : vector<8x8xf32>, vector<8x16xf32>, vector<8x16xf32> -> vector<8x16xf32>
    %82 = arith.truncf %81 : vector<8x16xf32> to vector<8x16xbf16>
    %c1_57 = arith.constant 1 : index
    %c0_58 = arith.constant 0 : index
    %c0_59 = arith.constant 0 : index
    %83 = vector.load %arg8[%c1_57, %c0_58, %c0_59] : memref<4x16x64xbf16, #tpu.memory_space<vmem>>, vector<1x16x64xbf16>
    %84 = vector.shape_cast %83 : vector<1x16x64xbf16> to vector<16x64xbf16>
    %cst_60 = arith.constant dense<0.000000e+00> : vector<8x64xf32>
    %85 = tpu.matmul %82, %84, %cst_60 {dimension_numbers = #tpu.dot_dimension_numbers<[1], [0], [0], [1], [0, 0, 1, 1], [], []>} : vector<8x16xbf16>, vector<16x64xbf16>, vector<8x64xf32> -> vector<8x64xf32>
    %86 = arith.addf %46, %85 : vector<8x64xf32>
    %c2 = arith.constant 2 : index
    %c0_61 = arith.constant 0 : index
    %c0_62 = arith.constant 0 : index
    %87 = vector.load %arg2[%c2, %c0_61, %c0_62] : memref<4x64x16xbf16, #tpu.memory_space<vmem>>, vector<1x64x16xbf16>
    %88 = vector.shape_cast %87 : vector<1x64x16xbf16> to vector<64x16xbf16>
    %cst_63 = arith.constant dense<0.000000e+00> : vector<8x16xf32>
    %89 = tpu.matmul %2, %88, %cst_63 {dimension_numbers = #tpu.dot_dimension_numbers<[1], [0], [0], [1], [0, 0, 1, 1], [], []>} : vector<8x64xbf16>, vector<64x16xbf16>, vector<8x16xf32> -> vector<8x16xf32>
    %c2_64 = arith.constant 2 : index
    %c0_65 = arith.constant 0 : index
    %c0_66 = arith.constant 0 : index
    %90 = vector.load %arg3[%c2_64, %c0_65, %c0_66] : memref<4x1x16xf32, #tpu.memory_space<vmem>>, vector<1x1x16xf32>
    %91 = vector.shape_cast %90 : vector<1x1x16xf32> to vector<1x16xf32>
    %92 = vector.broadcast %91 : vector<1x16xf32> to vector<8x16xf32>
    %93 = arith.addf %89, %92 : vector<8x16xf32>
    %c2_67 = arith.constant 2 : index
    %c0_68 = arith.constant 0 : index
    %c0_69 = arith.constant 0 : index
    %94 = vector.load %arg4[%c2_67, %c0_68, %c0_69] : memref<4x64x16xbf16, #tpu.memory_space<vmem>>, vector<1x64x16xbf16>
    %95 = vector.shape_cast %94 : vector<1x64x16xbf16> to vector<64x16xbf16>
    %cst_70 = arith.constant dense<0.000000e+00> : vector<8x16xf32>
    %96 = tpu.matmul %2, %95, %cst_70 {dimension_numbers = #tpu.dot_dimension_numbers<[1], [0], [0], [1], [0, 0, 1, 1], [], []>} : vector<8x64xbf16>, vector<64x16xbf16>, vector<8x16xf32> -> vector<8x16xf32>
    %c2_71 = arith.constant 2 : index
    %c0_72 = arith.constant 0 : index
    %c0_73 = arith.constant 0 : index
    %97 = vector.load %arg5[%c2_71, %c0_72, %c0_73] : memref<4x1x16xf32, #tpu.memory_space<vmem>>, vector<1x1x16xf32>
    %98 = vector.shape_cast %97 : vector<1x1x16xf32> to vector<1x16xf32>
    %99 = vector.broadcast %98 : vector<1x16xf32> to vector<8x16xf32>
    %100 = arith.addf %96, %99 : vector<8x16xf32>
    %c2_74 = arith.constant 2 : index
    %c0_75 = arith.constant 0 : index
    %c0_76 = arith.constant 0 : index
    %101 = vector.load %arg6[%c2_74, %c0_75, %c0_76] : memref<4x64x16xbf16, #tpu.memory_space<vmem>>, vector<1x64x16xbf16>
    %102 = vector.shape_cast %101 : vector<1x64x16xbf16> to vector<64x16xbf16>
    %cst_77 = arith.constant dense<0.000000e+00> : vector<8x16xf32>
    %103 = tpu.matmul %2, %102, %cst_77 {dimension_numbers = #tpu.dot_dimension_numbers<[1], [0], [0], [1], [0, 0, 1, 1], [], []>} : vector<8x64xbf16>, vector<64x16xbf16>, vector<8x16xf32> -> vector<8x16xf32>
    %c2_78 = arith.constant 2 : index
    %c0_79 = arith.constant 0 : index
    %c0_80 = arith.constant 0 : index
    %104 = vector.load %arg7[%c2_78, %c0_79, %c0_80] : memref<4x1x16xf32, #tpu.memory_space<vmem>>, vector<1x1x16xf32>
    %105 = vector.shape_cast %104 : vector<1x1x16xf32> to vector<1x16xf32>
    %106 = vector.broadcast %105 : vector<1x16xf32> to vector<8x16xf32>
    %107 = arith.addf %103, %106 : vector<8x16xf32>
    %cst_81 = arith.constant dense<0.000000e+00> : vector<8x8xf32>
    %108 = tpu.matmul %93, %100, %cst_81 {dimension_numbers = #tpu.dot_dimension_numbers<[1], [1], [0], [0], [0, 0, 1, 0], [], []>} : vector<8x16xf32>, vector<8x16xf32>, vector<8x8xf32> -> vector<8x8xf32>
    %cst_82 = arith.constant -1.000000e+30 : f32
    %109 = vector.broadcast %cst_82 : f32 to vector<8x8xf32>
    %110 = arith.select %5, %108, %109 : vector<8x8xi1>, vector<8x8xf32>
    %cst_83 = arith.constant dense<0xFF800000> : vector<8xf32>
    %111 = vector.multi_reduction <maximumf>, %110, %cst_83 [1] : vector<8x8xf32> to vector<8xf32>
    %112 = vector.shape_cast %111 : vector<8xf32> to vector<8x1xf32>
    %113 = vector.broadcast %112 : vector<8x1xf32> to vector<8x8xf32>
    %114 = arith.subf %110, %113 : vector<8x8xf32>
    %115 = math.exp %114 : vector<8x8xf32>
    %cst_84 = arith.constant dense<0.000000e+00> : vector<8xf32>
    %116 = vector.multi_reduction <add>, %115, %cst_84 [1] : vector<8x8xf32> to vector<8xf32>
    %117 = vector.shape_cast %116 : vector<8xf32> to vector<8x1xf32>
    %118 = tpu.reciprocal %117 {approx = true} : vector<8x1xf32> -> vector<8x1xf32>
    %119 = vector.broadcast %118 : vector<8x1xf32> to vector<8x8xf32>
    %120 = arith.mulf %115, %119 : vector<8x8xf32>
    %cst_85 = arith.constant dense<0.000000e+00> : vector<8x16xf32>
    %121 = tpu.matmul %120, %107, %cst_85 {dimension_numbers = #tpu.dot_dimension_numbers<[1], [0], [0], [1], [0, 0, 1, 1], [], []>} : vector<8x8xf32>, vector<8x16xf32>, vector<8x16xf32> -> vector<8x16xf32>
    %122 = arith.truncf %121 : vector<8x16xf32> to vector<8x16xbf16>
    %c2_86 = arith.constant 2 : index
    %c0_87 = arith.constant 0 : index
    %c0_88 = arith.constant 0 : index
    %123 = vector.load %arg8[%c2_86, %c0_87, %c0_88] : memref<4x16x64xbf16, #tpu.memory_space<vmem>>, vector<1x16x64xbf16>
    %124 = vector.shape_cast %123 : vector<1x16x64xbf16> to vector<16x64xbf16>
    %cst_89 = arith.constant dense<0.000000e+00> : vector<8x64xf32>
    %125 = tpu.matmul %122, %124, %cst_89 {dimension_numbers = #tpu.dot_dimension_numbers<[1], [0], [0], [1], [0, 0, 1, 1], [], []>} : vector<8x16xbf16>, vector<16x64xbf16>, vector<8x64xf32> -> vector<8x64xf32>
    %126 = arith.addf %86, %125 : vector<8x64xf32>
    %c3 = arith.constant 3 : index
    %c0_90 = arith.constant 0 : index
    %c0_91 = arith.constant 0 : index
    %127 = vector.load %arg2[%c3, %c0_90, %c0_91] : memref<4x64x16xbf16, #tpu.memory_space<vmem>>, vector<1x64x16xbf16>
    %128 = vector.shape_cast %127 : vector<1x64x16xbf16> to vector<64x16xbf16>
    %cst_92 = arith.constant dense<0.000000e+00> : vector<8x16xf32>
    %129 = tpu.matmul %2, %128, %cst_92 {dimension_numbers = #tpu.dot_dimension_numbers<[1], [0], [0], [1], [0, 0, 1, 1], [], []>} : vector<8x64xbf16>, vector<64x16xbf16>, vector<8x16xf32> -> vector<8x16xf32>
    %c3_93 = arith.constant 3 : index
    %c0_94 = arith.constant 0 : index
    %c0_95 = arith.constant 0 : index
    %130 = vector.load %arg3[%c3_93, %c0_94, %c0_95] : memref<4x1x16xf32, #tpu.memory_space<vmem>>, vector<1x1x16xf32>
    %131 = vector.shape_cast %130 : vector<1x1x16xf32> to vector<1x16xf32>
    %132 = vector.broadcast %131 : vector<1x16xf32> to vector<8x16xf32>
    %133 = arith.addf %129, %132 : vector<8x16xf32>
    %c3_96 = arith.constant 3 : index
    %c0_97 = arith.constant 0 : index
    %c0_98 = arith.constant 0 : index
    %134 = vector.load %arg4[%c3_96, %c0_97, %c0_98] : memref<4x64x16xbf16, #tpu.memory_space<vmem>>, vector<1x64x16xbf16>
    %135 = vector.shape_cast %134 : vector<1x64x16xbf16> to vector<64x16xbf16>
    %cst_99 = arith.constant dense<0.000000e+00> : vector<8x16xf32>
    %136 = tpu.matmul %2, %135, %cst_99 {dimension_numbers = #tpu.dot_dimension_numbers<[1], [0], [0], [1], [0, 0, 1, 1], [], []>} : vector<8x64xbf16>, vector<64x16xbf16>, vector<8x16xf32> -> vector<8x16xf32>
    %c3_100 = arith.constant 3 : index
    %c0_101 = arith.constant 0 : index
    %c0_102 = arith.constant 0 : index
    %137 = vector.load %arg5[%c3_100, %c0_101, %c0_102] : memref<4x1x16xf32, #tpu.memory_space<vmem>>, vector<1x1x16xf32>
    %138 = vector.shape_cast %137 : vector<1x1x16xf32> to vector<1x16xf32>
    %139 = vector.broadcast %138 : vector<1x16xf32> to vector<8x16xf32>
    %140 = arith.addf %136, %139 : vector<8x16xf32>
    %c3_103 = arith.constant 3 : index
    %c0_104 = arith.constant 0 : index
    %c0_105 = arith.constant 0 : index
    %141 = vector.load %arg6[%c3_103, %c0_104, %c0_105] : memref<4x64x16xbf16, #tpu.memory_space<vmem>>, vector<1x64x16xbf16>
    %142 = vector.shape_cast %141 : vector<1x64x16xbf16> to vector<64x16xbf16>
    %cst_106 = arith.constant dense<0.000000e+00> : vector<8x16xf32>
    %143 = tpu.matmul %2, %142, %cst_106 {dimension_numbers = #tpu.dot_dimension_numbers<[1], [0], [0], [1], [0, 0, 1, 1], [], []>} : vector<8x64xbf16>, vector<64x16xbf16>, vector<8x16xf32> -> vector<8x16xf32>
    %c3_107 = arith.constant 3 : index
    %c0_108 = arith.constant 0 : index
    %c0_109 = arith.constant 0 : index
    %144 = vector.load %arg7[%c3_107, %c0_108, %c0_109] : memref<4x1x16xf32, #tpu.memory_space<vmem>>, vector<1x1x16xf32>
    %145 = vector.shape_cast %144 : vector<1x1x16xf32> to vector<1x16xf32>
    %146 = vector.broadcast %145 : vector<1x16xf32> to vector<8x16xf32>
    %147 = arith.addf %143, %146 : vector<8x16xf32>
    %cst_110 = arith.constant dense<0.000000e+00> : vector<8x8xf32>
    %148 = tpu.matmul %133, %140, %cst_110 {dimension_numbers = #tpu.dot_dimension_numbers<[1], [1], [0], [0], [0, 0, 1, 0], [], []>} : vector<8x16xf32>, vector<8x16xf32>, vector<8x8xf32> -> vector<8x8xf32>
    %cst_111 = arith.constant -1.000000e+30 : f32
    %149 = vector.broadcast %cst_111 : f32 to vector<8x8xf32>
    %150 = arith.select %5, %148, %149 : vector<8x8xi1>, vector<8x8xf32>
    %cst_112 = arith.constant dense<0xFF800000> : vector<8xf32>
    %151 = vector.multi_reduction <maximumf>, %150, %cst_112 [1] : vector<8x8xf32> to vector<8xf32>
    %152 = vector.shape_cast %151 : vector<8xf32> to vector<8x1xf32>
    %153 = vector.broadcast %152 : vector<8x1xf32> to vector<8x8xf32>
    %154 = arith.subf %150, %153 : vector<8x8xf32>
    %155 = math.exp %154 : vector<8x8xf32>
    %cst_113 = arith.constant dense<0.000000e+00> : vector<8xf32>
    %156 = vector.multi_reduction <add>, %155, %cst_113 [1] : vector<8x8xf32> to vector<8xf32>
    %157 = vector.shape_cast %156 : vector<8xf32> to vector<8x1xf32>
    %158 = tpu.reciprocal %157 {approx = true} : vector<8x1xf32> -> vector<8x1xf32>
    %159 = vector.broadcast %158 : vector<8x1xf32> to vector<8x8xf32>
    %160 = arith.mulf %155, %159 : vector<8x8xf32>
    %cst_114 = arith.constant dense<0.000000e+00> : vector<8x16xf32>
    %161 = tpu.matmul %160, %147, %cst_114 {dimension_numbers = #tpu.dot_dimension_numbers<[1], [0], [0], [1], [0, 0, 1, 1], [], []>} : vector<8x8xf32>, vector<8x16xf32>, vector<8x16xf32> -> vector<8x16xf32>
    %162 = arith.truncf %161 : vector<8x16xf32> to vector<8x16xbf16>
    %c3_115 = arith.constant 3 : index
    %c0_116 = arith.constant 0 : index
    %c0_117 = arith.constant 0 : index
    %163 = vector.load %arg8[%c3_115, %c0_116, %c0_117] : memref<4x16x64xbf16, #tpu.memory_space<vmem>>, vector<1x16x64xbf16>
    %164 = vector.shape_cast %163 : vector<1x16x64xbf16> to vector<16x64xbf16>
    %cst_118 = arith.constant dense<0.000000e+00> : vector<8x64xf32>
    %165 = tpu.matmul %162, %164, %cst_118 {dimension_numbers = #tpu.dot_dimension_numbers<[1], [0], [0], [1], [0, 0, 1, 1], [], []>} : vector<8x16xbf16>, vector<16x64xbf16>, vector<8x64xf32> -> vector<8x64xf32>
    %166 = arith.addf %126, %165 : vector<8x64xf32>
    %c0_119 = arith.constant 0 : index
    %c0_120 = arith.constant 0 : index
    %167 = vector.load %arg9[%c0_119, %c0_120] : memref<1x64xf32, #tpu.memory_space<vmem>>, vector<1x64xf32>
    %168 = vector.broadcast %167 : vector<1x64xf32> to vector<8x64xf32>
    %169 = arith.addf %166, %168 : vector<8x64xf32>
    %170 = arith.addf %1, %169 : vector<8x64xf32>
    %c0_121 = arith.constant 0 : index
    %c0_122 = arith.constant 0 : index
    %171 = vector.load %arg10[%c0_121, %c0_122] : memref<1x64xf32, #tpu.memory_space<vmem>>, vector<1x64xf32>
    %c0_123 = arith.constant 0 : index
    %c0_124 = arith.constant 0 : index
    %172 = vector.load %arg11[%c0_123, %c0_124] : memref<1x64xf32, #tpu.memory_space<vmem>>, vector<1x64xf32>
    %cst_125 = arith.constant dense<0.000000e+00> : vector<8xf32>
    %173 = vector.multi_reduction <add>, %170, %cst_125 [1] : vector<8x64xf32> to vector<8xf32>
    %174 = vector.shape_cast %173 : vector<8xf32> to vector<8x1xf32>
    %cst_126 = arith.constant 6.400000e+01 : f32
    %175 = vector.broadcast %cst_126 : f32 to vector<8x1xf32>
    %176 = arith.divf %174, %175 : vector<8x1xf32>
    %177 = vector.broadcast %176 : vector<8x1xf32> to vector<8x64xf32>
    %178 = arith.subf %170, %177 : vector<8x64xf32>
    %179 = arith.mulf %178, %178 : vector<8x64xf32>
    %cst_127 = arith.constant dense<0.000000e+00> : vector<8xf32>
    %180 = vector.multi_reduction <add>, %179, %cst_127 [1] : vector<8x64xf32> to vector<8xf32>
    %181 = vector.shape_cast %180 : vector<8xf32> to vector<8x1xf32>
    %cst_128 = arith.constant 6.400000e+01 : f32
    %182 = vector.broadcast %cst_128 : f32 to vector<8x1xf32>
    %183 = arith.divf %181, %182 : vector<8x1xf32>
    %184 = vector.broadcast %176 : vector<8x1xf32> to vector<8x64xf32>
    %185 = arith.subf %170, %184 : vector<8x64xf32>
    %cst_129 = arith.constant 9.99999974E-6 : f32
    %186 = vector.broadcast %cst_129 : f32 to vector<8x1xf32>
    %187 = arith.addf %183, %186 : vector<8x1xf32>
    %188 = math.rsqrt %187 : vector<8x1xf32>
    %189 = vector.broadcast %188 : vector<8x1xf32> to vector<8x64xf32>
    %190 = arith.mulf %185, %189 : vector<8x64xf32>
    %191 = vector.broadcast %171 : vector<1x64xf32> to vector<8x64xf32>
    %192 = arith.mulf %190, %191 : vector<8x64xf32>
    %193 = vector.broadcast %172 : vector<1x64xf32> to vector<8x64xf32>
    %194 = arith.addf %192, %193 : vector<8x64xf32>
    %195 = arith.truncf %194 : vector<8x64xf32> to vector<8x64xbf16>
    %c0_130 = arith.constant 0 : index
    %c0_131 = arith.constant 0 : index
    %196 = vector.load %arg12[%c0_130, %c0_131] : memref<64x128xbf16, #tpu.memory_space<vmem>>, vector<64x128xbf16>
    %cst_132 = arith.constant dense<0.000000e+00> : vector<8x128xf32>
    %197 = tpu.matmul %195, %196, %cst_132 {dimension_numbers = #tpu.dot_dimension_numbers<[1], [0], [0], [1], [0, 0, 1, 1], [], []>} : vector<8x64xbf16>, vector<64x128xbf16>, vector<8x128xf32> -> vector<8x128xf32>
    %c0_133 = arith.constant 0 : index
    %c0_134 = arith.constant 0 : index
    %198 = vector.load %arg13[%c0_133, %c0_134] : memref<1x128xf32, #tpu.memory_space<vmem>>, vector<1x128xf32>
    %199 = vector.broadcast %198 : vector<1x128xf32> to vector<8x128xf32>
    %200 = arith.addf %197, %199 : vector<8x128xf32>
    %cst_135 = arith.constant 0.000000e+00 : f32
    %201 = vector.broadcast %cst_135 : f32 to vector<8x128xf32>
    %202 = arith.maximumf %200, %201 : vector<8x128xf32>
    %203 = arith.truncf %202 : vector<8x128xf32> to vector<8x128xbf16>
    %c0_136 = arith.constant 0 : index
    %c0_137 = arith.constant 0 : index
    %204 = vector.load %arg14[%c0_136, %c0_137] : memref<128x64xbf16, #tpu.memory_space<vmem>>, vector<128x64xbf16>
    %cst_138 = arith.constant dense<0.000000e+00> : vector<8x64xf32>
    %205 = tpu.matmul %203, %204, %cst_138 {dimension_numbers = #tpu.dot_dimension_numbers<[1], [0], [0], [1], [0, 0, 1, 1], [], []>} : vector<8x128xbf16>, vector<128x64xbf16>, vector<8x64xf32> -> vector<8x64xf32>
    %c0_139 = arith.constant 0 : index
    %c0_140 = arith.constant 0 : index
    %206 = vector.load %arg15[%c0_139, %c0_140] : memref<1x64xf32, #tpu.memory_space<vmem>>, vector<1x64xf32>
    %207 = vector.broadcast %206 : vector<1x64xf32> to vector<8x64xf32>
    %208 = arith.addf %205, %207 : vector<8x64xf32>
    %209 = arith.addf %194, %208 : vector<8x64xf32>
    %c0_141 = arith.constant 0 : index
    %c0_142 = arith.constant 0 : index
    %210 = vector.load %arg16[%c0_141, %c0_142] : memref<1x64xf32, #tpu.memory_space<vmem>>, vector<1x64xf32>
    %c0_143 = arith.constant 0 : index
    %c0_144 = arith.constant 0 : index
    %211 = vector.load %arg17[%c0_143, %c0_144] : memref<1x64xf32, #tpu.memory_space<vmem>>, vector<1x64xf32>
    %cst_145 = arith.constant dense<0.000000e+00> : vector<8xf32>
    %212 = vector.multi_reduction <add>, %209, %cst_145 [1] : vector<8x64xf32> to vector<8xf32>
    %213 = vector.shape_cast %212 : vector<8xf32> to vector<8x1xf32>
    %cst_146 = arith.constant 6.400000e+01 : f32
    %214 = vector.broadcast %cst_146 : f32 to vector<8x1xf32>
    %215 = arith.divf %213, %214 : vector<8x1xf32>
    %216 = vector.broadcast %215 : vector<8x1xf32> to vector<8x64xf32>
    %217 = arith.subf %209, %216 : vector<8x64xf32>
    %218 = arith.mulf %217, %217 : vector<8x64xf32>
    %cst_147 = arith.constant dense<0.000000e+00> : vector<8xf32>
    %219 = vector.multi_reduction <add>, %218, %cst_147 [1] : vector<8x64xf32> to vector<8xf32>
    %220 = vector.shape_cast %219 : vector<8xf32> to vector<8x1xf32>
    %cst_148 = arith.constant 6.400000e+01 : f32
    %221 = vector.broadcast %cst_148 : f32 to vector<8x1xf32>
    %222 = arith.divf %220, %221 : vector<8x1xf32>
    %223 = vector.broadcast %215 : vector<8x1xf32> to vector<8x64xf32>
    %224 = arith.subf %209, %223 : vector<8x64xf32>
    %cst_149 = arith.constant 9.99999974E-6 : f32
    %225 = vector.broadcast %cst_149 : f32 to vector<8x1xf32>
    %226 = arith.addf %222, %225 : vector<8x1xf32>
    %227 = math.rsqrt %226 : vector<8x1xf32>
    %228 = vector.broadcast %227 : vector<8x1xf32> to vector<8x64xf32>
    %229 = arith.mulf %224, %228 : vector<8x64xf32>
    %230 = vector.broadcast %210 : vector<1x64xf32> to vector<8x64xf32>
    %231 = arith.mulf %229, %230 : vector<8x64xf32>
    %232 = vector.broadcast %211 : vector<1x64xf32> to vector<8x64xf32>
    %233 = arith.addf %231, %232 : vector<8x64xf32>
    %234 = arith.truncf %233 : vector<8x64xf32> to vector<8x64xbf16>
    %c0_150 = arith.constant 0 : index
    %c0_151 = arith.constant 0 : index
    %235 = vector.load %arg18[%c0_150, %c0_151] : memref<64x512xbf16, #tpu.memory_space<vmem>>, vector<64x512xbf16>
    %cst_152 = arith.constant dense<0.000000e+00> : vector<8x512xf32>
    %236 = tpu.matmul %234, %235, %cst_152 {dimension_numbers = #tpu.dot_dimension_numbers<[1], [0], [0], [1], [0, 0, 1, 1], [], []>} : vector<8x64xbf16>, vector<64x512xbf16>, vector<8x512xf32> -> vector<8x512xf32>
    %c0_153 = arith.constant 0 : index
    %c0_154 = arith.constant 0 : index
    %237 = vector.load %arg19[%c0_153, %c0_154] : memref<1x512xf32, #tpu.memory_space<vmem>>, vector<1x512xf32>
    %238 = vector.broadcast %237 : vector<1x512xf32> to vector<8x512xf32>
    %239 = arith.addf %236, %238 : vector<8x512xf32>
    %240 = arith.truncf %239 : vector<8x512xf32> to vector<8x512xbf16>
    %c0_155 = arith.constant 0 : index
    %c0_156 = arith.constant 0 : index
    %c0_157 = arith.constant 0 : index
    %241 = vector.load %arg20[%c0_155, %c0_156, %c0_157] : memref<1x8x512xbf16, #tpu.memory_space<vmem>>, vector<1x8x512xbf16>
    %242 = vector.shape_cast %241 : vector<1x8x512xbf16> to vector<8x512xbf16>
    %243 = vector.shape_cast %240 : vector<8x512xbf16> to vector<1x8x512xbf16>
    tpu.vector_store %arg20[%c0_155, %c0_156, %c0_157], %243 {strides = array<i32>} : memref<1x8x512xbf16, #tpu.memory_space<vmem>>, vector<1x8x512xbf16>,
    return
  }
  func.func @transform_0(%arg0: i32) -> (i32, i32, i32) {
    %c0_i32 = arith.constant 0 : i32
    %c0_i32_0 = arith.constant 0 : i32
    %c0_i32_1 = arith.constant 0 : i32
    return %arg0, %c0_i32, %c0_i32_0 : i32, i32, i32
  }
  func.func @transform_1(%arg0: i32) -> (i32, i32, i32) {
    %c0_i32 = arith.constant 0 : i32
    %c0_i32_0 = arith.constant 0 : i32
    %c0_i32_1 = arith.constant 0 : i32
    %c0_i32_2 = arith.constant 0 : i32
    return %c0_i32, %c0_i32_0, %c0_i32_1 : i32, i32, i32
  }
  func.func @transform_2(%arg0: i32) -> (i32, i32, i32) {
    %c0_i32 = arith.constant 0 : i32
    %c0_i32_0 = arith.constant 0 : i32
    %c0_i32_1 = arith.constant 0 : i32
    %c0_i32_2 = arith.constant 0 : i32
    return %c0_i32, %c0_i32_0, %c0_i32_1 : i32, i32, i32
  }
  func.func @transform_3(%arg0: i32) -> (i32, i32, i32) {
    %c0_i32 = arith.constant 0 : i32
    %c0_i32_0 = arith.constant 0 : i32
    %c0_i32_1 = arith.constant 0 : i32
    %c0_i32_2 = arith.constant 0 : i32
    return %c0_i32, %c0_i32_0, %c0_i32_1 : i32, i32, i32
  }
  func.func @transform_4(%arg0: i32) -> (i32, i32, i32) {
    %c0_i32 = arith.constant 0 : i32
    %c0_i32_0 = arith.constant 0 : i32
    %c0_i32_1 = arith.constant 0 : i32
    %c0_i32_2 = arith.constant 0 : i32
    return %c0_i32, %c0_i32_0, %c0_i32_1 : i32, i32, i32
  }
  func.func @transform_5(%arg0: i32) -> (i32, i32, i32) {
    %c0_i32 = arith.constant 0 : i32
    %c0_i32_0 = arith.constant 0 : i32
    %c0_i32_1 = arith.constant 0 : i32
    %c0_i32_2 = arith.constant 0 : i32
    return %c0_i32, %c0_i32_0, %c0_i32_1 : i32, i32, i32
  }
  func.func @transform_6(%arg0: i32) -> (i32, i32, i32) {
    %c0_i32 = arith.constant 0 : i32
    %c0_i32_0 = arith.constant 0 : i32
    %c0_i32_1 = arith.constant 0 : i32
    %c0_i32_2 = arith.constant 0 : i32
    return %c0_i32, %c0_i32_0, %c0_i32_1 : i32, i32, i32
  }
  func.func @transform_7(%arg0: i32) -> (i32, i32, i32) {
    %c0_i32 = arith.constant 0 : i32
    %c0_i32_0 = arith.constant 0 : i32
    %c0_i32_1 = arith.constant 0 : i32
    %c0_i32_2 = arith.constant 0 : i32
    return %c0_i32, %c0_i32_0, %c0_i32_1 : i32, i32, i32
  }
  func.func @transform_8(%arg0: i32) -> (i32, i32) {
    %c0_i32 = arith.constant 0 : i32
    %c0_i32_0 = arith.constant 0 : i32
    %c0_i32_1 = arith.constant 0 : i32
    return %c0_i32, %c0_i32_0 : i32, i32
  }
  func.func @transform_9(%arg0: i32) -> (i32, i32) {
    %c0_i32 = arith.constant 0 : i32
    %c0_i32_0 = arith.constant 0 : i32
    %c0_i32_1 = arith.constant 0 : i32
    return %c0_i32, %c0_i32_0 : i32, i32
  }
  func.func @transform_10(%arg0: i32) -> (i32, i32) {
    %c0_i32 = arith.constant 0 : i32
    %c0_i32_0 = arith.constant 0 : i32
    %c0_i32_1 = arith.constant 0 : i32
    return %c0_i32, %c0_i32_0 : i32, i32
  }
  func.func @transform_11(%arg0: i32) -> (i32, i32) {
    %c0_i32 = arith.constant 0 : i32
    %c0_i32_0 = arith.constant 0 : i32
    %c0_i32_1 = arith.constant 0 : i32
    return %c0_i32, %c0_i32_0 : i32, i32
  }
  func.func @transform_12(%arg0: i32) -> (i32, i32) {
    %c0_i32 = arith.constant 0 : i32
    %c0_i32_0 = arith.constant 0 : i32
    %c0_i32_1 = arith.constant 0 : i32
    return %c0_i32, %c0_i32_0 : i32, i32
  }
  func.func @transform_13(%arg0: i32) -> (i32, i32) {
    %c0_i32 = arith.constant 0 : i32
    %c0_i32_0 = arith.constant 0 : i32
    %c0_i32_1 = arith.constant 0 : i32
    return %c0_i32, %c0_i32_0 : i32, i32
  }
  func.func @transform_14(%arg0: i32) -> (i32, i32) {
    %c0_i32 = arith.constant 0 : i32
    %c0_i32_0 = arith.constant 0 : i32
    %c0_i32_1 = arith.constant 0 : i32
    return %c0_i32, %c0_i32_0 : i32, i32
  }
  func.func @transform_15(%arg0: i32) -> (i32, i32) {
    %c0_i32 = arith.constant 0 : i32
    %c0_i32_0 = arith.constant 0 : i32
    %c0_i32_1 = arith.constant 0 : i32
    return %c0_i32, %c0_i32_0 : i32, i32
  }
  func.func @transform_16(%arg0: i32) -> (i32, i32) {
    %c0_i32 = arith.constant 0 : i32
    %c0_i32_0 = arith.constant 0 : i32
    %c0_i32_1 = arith.constant 0 : i32
    return %c0_i32, %c0_i32_0 : i32, i32
  }
  func.func @transform_17(%arg0: i32) -> (i32, i32) {
    %c0_i32 = arith.constant 0 : i32
    %c0_i32_0 = arith.constant 0 : i32
    %c0_i32_1 = arith.constant 0 : i32
    return %c0_i32, %c0_i32_0 : i32, i32
  }
  func.func @transform_18(%arg0: i32) -> (i32, i32) {
    %c0_i32 = arith.constant 0 : i32
    %c0_i32_0 = arith.constant 0 : i32
    %c0_i32_1 = arith.constant 0 : i32
    return %c0_i32, %c0_i32_0 : i32, i32
  }
  func.func @transform_19(%arg0: i32) -> (i32, i32, i32) {
    %c0_i32 = arith.constant 0 : i32
    %c0_i32_0 = arith.constant 0 : i32
    %c0_i32_1 = arith.constant 0 : i32
    return %arg0, %c0_i32, %c0_i32_0 : i32, i32, i32
  }
}

</mosaic_0001>

<bundles_post_ra>
// kernel: squeeze.4
= control target key start
LH: loop header
LB: loop body
LE: loop exit
PB: predicated region body
PF: predicated region fallthrough
CT: control target
= control target key end

     0   :  { %s106_s0 = inlined_call_operand.vmem [shape: f32[2,32], index: 0, kind: input, shape index: {}]   ;;  %s107_s1 = inlined_call_operand.hbm [shape: f32[2,4,8], index: 1, kind: output, shape index: {}]  }
   0x1   :  { %v5_v0 = vld [vmem:[%s106_s0] sm:$0x3] }
   0x2   :  { %6 = vst [vmem:[#allocation3] sm:$0x3] %v5_v0 }
   0x3   :  { %2 = vsyncpa [#allocation1], 0  ;;  %s77_s0 = smov 120   ;;  %s78_s8 = smov 104   ;;  %vm8_vm0 = vcmask 64512  }
   0x4   :  { %s79_s9 = smov 112   ;;  %s80_s10 = smov [#allocation0]  }
   0x5   :  { %s43_s11 = sshll.u32 %s80_s10, 4  ;;  %s44_s11 = int_to_ptr.vmem [resolvable:$true] %s43_s11 }
   0x6   :  { %s53_s12 = scalar_lea.vmem %s44_s11, 128  ;;  %p58_p1 = scmp.lt.s32.totalorder %s44_s11, %s44_s11 }
   0x7   :  { %p54_p0 = scmp.ne.s32.totalorder %s44_s11, %s53_s12  ;;  %p59_p2 = scmp.lt.s32.totalorder %s53_s12, %s53_s12 }
   0x9   :  { %v10_v1 = vld [vmem:[#allocation3] sm:$0x3]   ;;  %p60_p3 = por %p59_p2, %p58_p1 }
   0xa   :  { %v22_v2 = vld [vmem:[#allocation3] sm:$0x3]   ;;  %11 = vrot.lane.b32.xlu0 %v10_v1, %s77_s0 }
   0xb   :  { %23 = vrot.lane.b32.xlu1 %v22_v2, %s78_s8  ;;  %v7_v3 = vld [vmem:[#allocation3] sm:$0x3]   ;;  %p61_p4 = pnand %p60_p3, %p54_p0 }
   0xc   :  { %v16_v4 = vld [vmem:[#allocation3] sm:$0x3]   ;;  %9 = vst.msk [vmem:[#allocation2] ss:$8 sm:$0x3] %vm8_vm0, %v7_v3  }
   0xe   :  { %17 = vrot.lane.b32.xlu0 %v16_v4, %s79_s9 }
  0x7c   :  { %v12_v5 = vpop.permute.xlu0 %11  }
  0x7d   :  { %v24_v6 = vpop.permute.xlu1 %23   ;;  %15 = vst.msk [vmem:[#allocation2 + $0x1] ss:$8 sm:$0x3] %vm8_vm0, %v12_v5  }
  0x7e   :  { %27 = vst.msk [vmem:[#allocation2 + $0x3] ss:$8 sm:$0x3] %vm8_vm0, %v24_v6  }
  0x80   :  { %v18_v7 = vpop.permute.xlu0 %17  }
  0x81   :  { %21 = vst.msk [vmem:[#allocation2 + $0x2] ss:$8 sm:$0x3] %vm8_vm0, %v18_v7  }
  0x88   :  { %v31_v8 = vld [vmem:[#allocation2] sm:$0xf]  ;;  %v35_v9 = vld [vmem:[#allocation2 + $0x8] sm:$0xf] }
  0x89   :  { %33 = vst [vmem:[#allocation0] sm:$0xf] %v31_v8  ;;  %38 = vst [vmem:[#allocation0 + $0x4] sm:$0xf] %v35_v9 }
  0x8a   :  { %64 = shalt.err (!%p61_p4)
}
  0x8b   :  { %s65_s15 = scalar_lea.hbm %s107_s1, 128 }
  0x8c   :  { %p66_p5 = scmp.ne.s32.totalorder %s107_s1, %s65_s15  ;;  %p69_p6 = scmp.lt.u32.totalorder %s65_s15, %s107_s1 }
  0x8e   :  { %p71_p7 = pnand %p69_p6, %p66_p5 }
  0x90   :  { %74 = shalt.err (!%p71_p7)
}
  0x91   :  { %46 = dma.vmem_to_hbm [thread:$0]  %s44_s11, 128, %s107_s1, [#allocation1]  }
  0x92   :  { %75 = dma.done.wait [#allocation1], 128  }
  0x93   :  { %76 = vsyncadd [#allocation1], 4294967168 }
  0x94   :  { %48 = vsyncpa [#allocation1], 1 }

// kernel: multi_head_prediction_forward.3
= control target key start
LH: loop header
LB: loop body
LE: loop exit
PB: predicated region body
PF: predicated region fallthrough
CT: control target
= control target key end

     0   :  { %s524_s9 = smov 0   ;;  %s526_s10 = smov 0   ;;  %s578_s0 = inlined_call_operand.vmem [shape: bf16[2,8,512], index: 0, kind: input, shape index: {}]   ;;  %s579_s1 = inlined_call_operand.vmem [shape: f32[4,2,4,8,128], index: 1, kind: input, shape index: {}]   ;;  %s580_s2 = inlined_call_operand.vmem [shape: f32[4,2,1,1,32], index: 2, kind: output, shape index: {}]  }
   0x1   :  { %s528_s11 = smov 0   ;;  %s530_s12 = smov 0  }
   0x2   :  { %s532_s13 = smov 0  }
   0x3 LB: > { %s27_s14 = sadd.s32 1, %s499_s11  ;;  %s31_s15 = sadd.s32 1, %s503_s12  ;;  %s507_s13 = sphi %s532_s13, %s12_s13   ;;  %s503_s12 = sphi %s530_s12, %s584_s12   ;;  %s499_s11 = sphi %s528_s11, %s583_s11   ;;  %s495_s10 = sphi %s526_s10, %s582_s10   ;;  %s491_s9 = sphi %s524_s9, %s581_s9  }
   0x4   : > { %p29_p0 = scmp.ge.s32.totalorder %s27_s14, 2  ;;  %p417_p1 = scmp.ge.s32.totalorder %s507_s13, 1 }
   0x5   : > { %p163_p2 = scmp.lt.s32.totalorder %s507_s13, 9 }
   0x6   : > { %s586_s14 = smov (%p29_p0, %s27_s14), 0  ;;  %s588_s15 = smov (!%p29_p0, %s31_s15), %s503_s12 }
   0x7   : > { %p164_p3 = pnand %p417_p1, %p163_p2  ;;  %p33_p4 = scmp.ge.s32.totalorder %s588_s15, 4 }
   0x8   : > { %p206_p5 = scmp.lt.s32.totalorder (!%p164_p3), %s491_s9, 1  ;;  %p208_p6 = scmp.lt.s32.totalorder (!%p164_p3), %s495_s10, 3  ;;  %v260_v10 = vlaneseq (!%p164_p3)  ;;  %vm288_vm0 = vcmask (!%p164_p3), 64512   ;;  %vm290_vm1 = vcmask (!%p164_p3), 130048   ;;  %vm292_vm2 = vcmask (!%p164_p3), 195584  }
   0x9   : > { %s590_s15 = smov (%p33_p4, %s588_s15), 0  ;;  %167 = sbr.rel (%p164_p3) target bundleno = 178 (0xb2), region = 28 }
   0xa   : > { %v261_v11 = vand.u32 (!%p164_p3), 127, %v260_v10  ;;  %v263_v12 = vshrl.u32 (!%p164_p3), %v260_v10, 7  ;;  %vm294_vm3 = vcmask (!%p164_p3), 253952  }
   0xc   : > { %v268_v13 = vadd.s32 (!%p164_p3), 4294967288, %v261_v11  ;;  %v282_v14 = vadd.s32 (!%p164_p3), 4294967272, %v261_v11  ;;  %v275_v15 = vadd.s32 (!%p164_p3), 4294967280, %v261_v11  ;;  %v264_v18 = vsub.s32 (!%p164_p3), %v261_v11, %v263_v12 }
   0xe   : > { %v271_v19 = vsub.s32 (!%p164_p3), %v268_v13, %v263_v12  ;;  %v285_v20 = vsub.s32 (!%p164_p3), %v282_v14, %v263_v12  ;;  %v278_v21 = vsub.s32 (!%p164_p3), %v275_v15, %v263_v12 }
  0x10   : > { %s592_s9 = smov (!%p206_p5, %s491_s9), 1  ;;  %s594_s10 = smov (!%p208_p6, %s495_s10), 3 }
  0x11   : > { %s418_s16 = sshll.u32 %s592_s9, 2  ;;  %s421_s18 = sshll.u32 %s594_s10, 3 }
  0x12   : > { %s211_s17 = sadd.s32 %s418_s16, %s594_s10  ;;  %s224_s20 = sadd.s32 %s421_s18, %s418_s16 }
  0x13   : > { %s419_s19 = sshll.u32 %s211_s17, 2  ;;  %s422_s24 = sshll.u32 %s224_s20, 3 }
  0x14   : > { %s213_s23 = scalar_lea.vmem %s578_s0, %s419_s19  ;;  %s226_s27 = scalar_lea.vmem %s579_s1, %s422_s24 }
  0x15   : > { %v238_v0 = vld [vmem:[%s213_s23] sm:$0xf]  ;;  %v425_v3 = vld [vmem:[%s226_s27 + $0x10] sm:$0xff]  ;;  %v424_v4 = vld [vmem:[%s226_s27 + $0x8] sm:$0xff]  ;;  %s423_s28 = sshll.u32 %s594_s10, 1 }
  0x16   : > { %v239_v1 = vunpack.c.l.bf16 %v238_v0  ;;  %v240_v2 = vld [vmem:[%s226_s27] sm:$0xff]  ;;  %v426_v5 = vld [vmem:[%s226_s27 + $0x18] sm:$0xff]  ;;  %s236_s29 = sadd.s32 %s423_s28, %s592_s9 }
  0x17   : > { %s237_s4 = scalar_lea.vmem %s580_s2, %s236_s29 }
  0x18   : > { %v241_v6 = vmul.f32 %v240_v2, %v239_v1  ;;  %v251_v7 = vmul.f32 %v425_v3, %v239_v1  ;;  %v246_v8 = vmul.f32 %v424_v4, %v239_v1  ;;  %v256_v9 = vmul.f32 %v426_v5, %v239_v1 }
  0x1a   : > { %242 = vadd.xlane.f32.xlu0 %v241_v6  ;;  %252 = vadd.xlane.f32.xlu1 %v251_v7 }
  0x1e   : > { %247 = vadd.xlane.f32.xlu0 %v246_v8  ;;  %257 = vadd.xlane.f32.xlu1 %v256_v9 }
  0xa7   : > { %v243_v16 = vpop.xlane.xlu0 %242  ;;  %v253_v17 = vpop.xlane.xlu1 %252 }
  0xa8   : > { %v265_v24 = vrot.slane %v243_v16, %v264_v18  ;;  %v279_v27 = vrot.slane %v253_v17, %v278_v21 }
  0xab   : > { %v248_v22 = vpop.xlane.xlu0 %247  ;;  %v258_v23 = vpop.xlane.xlu1 %257 }
  0xac   : > { %v272_v25 = vrot.slane %v248_v22, %v271_v19  ;;  %v286_v26 = vrot.slane %v258_v23, %v285_v20 }
  0xae   : > { %v289_v28 = vsel %vm288_vm0, %v265_v24, %v272_v25 }
  0xaf   : > { %v291_v29 = vsel %vm290_vm1, %v289_v28, %v279_v27 }
  0xb0   : > { %v293_v30 = vsel %vm292_vm2, %v291_v29, %v286_v26 }
  0xb1   : > { %295 = vst.msk [vmem:[%s237_s4] sm:$0x1] %vm294_vm3, %v293_v30 }
  0xb2 PF: > { %s12_s13 = sadd.s32 1, %s507_s13   ;;  %s581_s9 = smov %s499_s11 }
  0xb3   : > { %p9_p7 = scmp.ge.s32.totalorder %s12_s13, 10   ;;  %s582_s10 = smov %s503_s12 }
  0xb4   : > { %s583_s11 = smov %s586_s14  ;;  %s584_s12 = smov %s590_s15 }
  0xb5   :  { %11 = sbr.rel (!%p9_p7) target bundleno = 3 (0x3), region = 64 }

// kernel: multi_head_prediction_forward.2
= control target key start
LH: loop header
LB: loop body
LE: loop exit
PB: predicated region body
PF: predicated region fallthrough
CT: control target
= control target key end

     0   :  { %s4314_s0 = inlined_call_operand.vmem [shape: f32[2,8,64], index: 0, kind: input, shape index: {}]   ;;  %s4315_s1 = inlined_call_operand.vmem [shape: bf16[4,64,16], index: 1, kind: input, shape index: {}]   ;;  %s4316_s2 = inlined_call_operand.vmem [shape: f32[4,1,16], index: 2, kind: input, shape index: {}]   ;;  %s4317_s3 = inlined_call_operand.vmem [shape: bf16[4,64,16], index: 3, kind: input, shape index: {}]   ;;  %s4318_s4 = inlined_call_operand.vmem [shape: f32[4,1,16], index: 4, kind: input, shape index: {}]   ;;  %s4319_s5 = inlined_call_operand.vmem [shape: bf16[4,64,16], index: 5, kind: input, shape index: {}]   ;;  %s4320_s6 = inlined_call_operand.vmem [shape: f32[4,1,16], index: 6, kind: input, shape index: {}]   ;;  %s4321_s7 = inlined_call_operand.vmem [shape: bf16[4,16,64], index: 7, kind: input, shape index: {}]   ;;  %s4322_s8 = inlined_call_operand.vmem [shape: f32[1,64], index: 8, kind: input, shape index: {}]   ;;  %s4323_s9 = inlined_call_operand.vmem [shape: f32[1,64], index: 9, kind: input, shape index: {}]   ;;  %s4324_s10 = inlined_call_operand.vmem [shape: f32[1,64], index: 10, kind: input, shape index: {}]   ;;  %s4325_s11 = inlined_call_operand.vmem [shape: bf16[64,128], index: 11, kind: input, shape index: {}]   ;;  %s4326_s12 = inlined_call_operand.vmem [shape: f32[1,128], index: 12, kind: input, shape index: {}]   ;;  %s4327_s13 = inlined_call_operand.vmem [shape: bf16[128,64], index: 13, kind: input, shape index: {}]   ;;  %s4328_s14 = inlined_call_operand.vmem [shape: f32[1,64], index: 14, kind: input, shape index: {}]   ;;  %s4329_s15 = inlined_call_operand.vmem [shape: f32[1,64], index: 15, kind: input, shape index: {}]   ;;  %s4330_s16 = inlined_call_operand.vmem [shape: f32[1,64], index: 16, kind: input, shape index: {}]   ;;  %s4331_s17 = inlined_call_operand.vmem [shape: bf16[64,512], index: 17, kind: input, shape index: {}]   ;;  %s4332_s18 = inlined_call_operand.vmem [shape: f32[1,512], index: 18, kind: input, shape index: {}]   ;;  %s4333_s19 = inlined_call_operand.vmem [shape: bf16[2,8,512], index: 19, kind: output, shape index: {}]  }
   0x1   :  { %4337 = sst [smem:[#allocation2_spill]] %s4314_s0  ;;  %s3779_s0 = smov 0  }
   0x2   :  { %4338 = sst [smem:[#allocation3_spill]] %s4315_s1 }
   0x3   :  { %4339 = sst [smem:[#allocation4_spill]] %s4316_s2 }
   0x4   :  { %4340 = sst [smem:[#allocation5_spill]] %s4317_s3 }
   0x5 LB: > { %s2979_s30 = sadd.s32 4294967295, %s3674_s0   ;;  %p2983_p0 = scmp.ge.s32.totalorder %s3674_s0, 1  ;;  %s3674_s0 = sphi %s3779_s0, %s29_s0  }
   0x6   : > { %p536_p1 = scmp.lt.s32.totalorder %s3674_s0, 3 }
   0x8   : > { %p537_p2 = pnand %p2983_p0, %p536_p1 }
   0x9   : > { %s4341_s1 = sld [smem:[#allocation3_spill]] (!%p537_p2)  ;;  %v3676_v1 = vmov (!%p537_p2), 0.0   ;;  %s4342_s23 = sld [smem:[#allocation5_spill]] (!%p537_p2)  ;;  %vm3677_vm0 = vmmov (!%p537_p2), 0   ;;  %vm647_vm1 = vcmask (!%p537_p2), 523264   ;;  %vm849_vm2 = vcmask (!%p537_p2), 130048  }
   0xa   : > { %540 = sbr.rel (%p537_p2) target bundleno = 5208 (0x1458), region = 96  ;;  %3309 = vmatprep.subr.bf16.mxu0 (!%p537_p2), %v3676_v1  ;;  %3321 = vmatprep.subr.bf16.mxu1 (!%p537_p2), %v3676_v1  ;;  %p591_p3 = scmp.lt.s32.totalorder (!%p537_p2), %s2979_s30, 1  ;;  %v2993_v11 = vld [vmem:[%s4318_s4] ss:$0 sm:$0xff] (!%p537_p2)  ;;  %v3569_v24 = vld [vmem:[%s4319_s5 + $0x8] sm:$0xff] (!%p537_p2)   ;;  %v3570_v25 = vld [vmem:[%s4319_s5 + $0x10] sm:$0xff] (!%p537_p2)   ;;  %v603_v27 = vlaneseq (!%p537_p2) }
   0xb   : > { %3317 = vmatprep.mubr.msk.bf16.mxu0 (!%p537_p2), %vm3677_vm0, %v3676_v1  ;;  %3329 = vmatprep.mubr.msk.bf16.mxu1 (!%p537_p2), %vm3677_vm0, %v3676_v1  ;;  %s4343_s24 = sld [smem:[#allocation2_spill]] (!%p537_p2)  ;;  %s4344_s2 = sld [smem:[#allocation4_spill]] (!%p537_p2)  ;;  %v3568_v23 = vld [vmem:[%s4319_s5] sm:$0xff] (!%p537_p2)   ;;  %v3571_v26 = vld [vmem:[%s4319_s5 + $0x18] sm:$0xff] (!%p537_p2)   ;;  %vm927_vm4 = vcmask (!%p537_p2), 64512   ;;  %v3581_v57 = vld [vmem:[%s4319_s5 + $0x28] sm:$0xff] (!%p537_p2)  }
   0xc   : > { %v3876_v28 = vshrl.u32 (!%p537_p2), %v603_v27, 7  ;;  %v3878_v29 = vand.u32 (!%p537_p2), 127, %v603_v27  ;;  %v2999_v43 = vld [vmem:[%s4320_s6] ss:$0 sm:$0xff] (!%p537_p2)  ;;  %v3582_v58 = vld [vmem:[%s4319_s5 + $0x30] sm:$0xff] (!%p537_p2)   ;;  %v3583_v59 = vld [vmem:[%s4319_s5 + $0x38] sm:$0xff] (!%p537_p2)  }
   0xd   : > { %v3580_v56 = vld [vmem:[%s4319_s5 + $0x20] sm:$0xff] (!%p537_p2)  }
   0xe   : > { %vm607_vm3 = vcmp.le.s32.totalorder (!%p537_p2), %v3878_v29, %v3876_v28  ;;  %v3032_v60 = vld [vmem:[%s4318_s4 + $0x1] ss:$0 sm:$0xff] (!%p537_p2)  ;;  %v3153_v29 = vld [vmem:[%s4320_s6 + $0x3] ss:$0 sm:$0xff] (!%p537_p2) }
   0xf   : > { %v3560_v0 = vld [vmem:[%s4341_s1] sm:$0xff] (!%p537_p2)   ;;  %v3562_v3 = vld [vmem:[%s4341_s1 + $0x8] sm:$0xff] (!%p537_p2)   ;;  %v3564_v5 = vld [vmem:[%s4341_s1 + $0x10] sm:$0xff] (!%p537_p2)  }
  0x10   : > { %v3561_v2 = vld [vmem:[%s4342_s23] sm:$0xff] (!%p537_p2)   ;;  %3310 = vmatpush3.bf16.msra.mxu0 (!%p537_p2), %v3560_v0  ;;  %v3563_v4 = vld [vmem:[%s4342_s23 + $0x8] sm:$0xff] (!%p537_p2)   ;;  %v3565_v6 = vld [vmem:[%s4342_s23 + $0x10] sm:$0xff] (!%p537_p2)  }
  0x11   : > { %3322 = vmatpush3.bf16.msra.mxu1 %v3561_v2  ;;  %3311 = vmatprep.subr.bf16.mxu0 %v3676_v1  ;;  %s4346_s30 = smov (!%p591_p3, %s2979_s30), 1  ;;  %v3566_v7 = vld [vmem:[%s4341_s1 + $0x18] sm:$0xff]   ;;  %v2987_v12 = vld [vmem:[%s4344_s2] ss:$0 sm:$0xff]  ;;  %v3573_v46 = vld [vmem:[%s4342_s23 + $0x28] sm:$0xff]  }
  0x12   : > { %3323 = vmatprep.subr.bf16.mxu1 %v3676_v1  ;;  %s2984_s29 = sshll.u32 %s4346_s30, 3  ;;  %v3567_v9 = vld [vmem:[%s4342_s23 + $0x18] sm:$0xff]   ;;  %v3572_v40 = vld [vmem:[%s4342_s23 + $0x20] sm:$0xff]   ;;  %v3575_v47 = vld [vmem:[%s4342_s23 + $0x30] sm:$0xff]  }
  0x13   : > { %s594_s25 = scalar_lea.vmem %s4343_s24, %s2984_s29  ;;  %v3577_v48 = vld [vmem:[%s4342_s23 + $0x38] sm:$0xff]   ;;  %v3574_v51 = vld [vmem:[%s4341_s1 + $0x20] sm:$0xff]   ;;  %v3576_v53 = vld [vmem:[%s4341_s1 + $0x28] sm:$0xff]   ;;  %s3208_s24 = sshll.u32 %s4346_s30, 4 }
  0x14   : > { %3312 = vmatpush3.bf16.msra.mxu0 %v3562_v3  ;;  %v3824_v8 = vld [vmem:[%s594_s25] sm:$0xff]  ;;  %v3578_v54 = vld [vmem:[%s4341_s1 + $0x30] sm:$0xff]   ;;  %v3579_v55 = vld [vmem:[%s4341_s1 + $0x38] sm:$0xff]   ;;  %s599_s26 = scalar_lea.vmem %s4333_s19, %s3208_s24 }
  0x15   : > { %3324 = vmatpush3.bf16.msra.mxu1 %v3563_v4  ;;  %3313 = vmatprep.subr.bf16.mxu0 %v3676_v1  ;;  %v3833_v10 = vpack.c.bf16 %v3824_v8, %v3824_v8 }
  0x16   : > { %3325 = vmatprep.subr.bf16.mxu1 %v3676_v1 }
  0x18   : > { %3314 = vmatpush3.bf16.msra.mxu0 %v3564_v5  ;;  %v3017_v5 = vld [vmem:[%s4344_s2 + $0x1] ss:$0 sm:$0xff] }
  0x19   : > { %3326 = vmatpush3.bf16.msra.mxu1 %v3565_v6  ;;  %3315 = vmatprep.subr.bf16.mxu0 %v3676_v1 }
  0x1a   : > { %3327 = vmatprep.subr.bf16.mxu1 %v3676_v1 }
  0x1c   : > { %3316 = vmatpush3.bf16.msra.mxu0 %v3566_v7  ;;  %v3584_v7 = vld [vmem:[%s4321_s7] sm:$0xff]  }
  0x1d   : > { %3328 = vmatpush3.bf16.msra.mxu1 %v3567_v9  ;;  %3333 = vmatprep.subr.bf16.mxu0 %v3676_v1 }
  0x1e   : > { %3345 = vmatprep.subr.mxu1 %v3676_v1 }
  0x1f   : > { %3318 = vmatmul.mubr.msk.bf16.vlgmr.msra.gmra.mrb[0].mxu0 %vm647_vm1, %v3833_v10 }
  0x20   : > { %3330 = vmatmul.mubr.msk.bf16.vlgmr.msra.gmra.mrb[0].mxu1 %vm647_vm1, %v3833_v10  ;;  %3341 = vmatprep.mubr.msk.bf16.mxu0 %vm3677_vm0, %v3676_v1 }
  0x21   : > { %3347 = vmatprep.mubr.msk.f32.mxu1 %vm3677_vm0, %v3676_v1  ;;  %3334 = vmatpush3.bf16.msra.mxu0 %v3568_v23 }
  0x22   : > { %3335 = vmatprep.subr.bf16.mxu0 %v3676_v1 }
  0x25   : > { %3336 = vmatpush3.bf16.msra.mxu0 %v3569_v24 }
  0x26   : > { %3337 = vmatprep.subr.bf16.mxu0 %v3676_v1 }
  0x29   : > { %3338 = vmatpush3.bf16.msra.mxu0 %v3570_v25 }
  0x2a   : > { %3339 = vmatprep.subr.bf16.mxu0 %v3676_v1 }
  0x2d   : > { %3340 = vmatpush3.bf16.msra.mxu0 %v3571_v26 }
  0x2e   : > { %3367 = vmatprep.subr.bf16.mxu0 %v3676_v1 }
  0x30   : > { %3342 = vmatmul.mubr.msk.bf16.vlgmr.msra.gmra.mrb[4].mxu0 %vm647_vm1, %v3833_v10 }
  0x31   : > { %3375 = vmatprep.mubr.msk.bf16.mxu0 %vm3677_vm0, %v3676_v1  ;;  %3368 = vmatpush3.bf16.msra.mxu0 %v3572_v40 }
  0x32   : > { %3369 = vmatprep.subr.bf16.mxu0 %v3676_v1 }
  0x35   : > { %3370 = vmatpush3.bf16.msra.mxu0 %v3573_v46 }
  0x36   : > { %3371 = vmatprep.subr.bf16.mxu0 %v3676_v1 }
  0x39   : > { %3372 = vmatpush3.bf16.msra.mxu0 %v3575_v47 }
  0x3a   : > { %3373 = vmatprep.subr.bf16.mxu0 %v3676_v1 }
  0x3d   : > { %3374 = vmatpush3.bf16.msra.mxu0 %v3577_v48  ;;  %v3590_v48 = vld [vmem:[%s4341_s1 + $0x48] sm:$0xff]  }
  0x3e   : > { %3396 = vmatprep.subr.mxu0 %v3676_v1 }
  0x40   : > { %3376 = vmatmul.mubr.msk.bf16.vlgmr.msra.gmra.mrb[8].mxu0 %vm647_vm1, %v3833_v10 }
  0x41   : > { %3398 = vmatprep.mubr.msk.f32.mxu0 %vm3677_vm0, %v3676_v1 }
  0xf2   : > { %v685_v13 = vpop.f32.mrb[0].mxu0 }
  0xf3   : > { %v764_v14 = vpop.f32.mrb[0].mxu1  ;;  %v3319_v15 = vpop.f32.mrb[1].mxu0  ;;  %v686_v19 = vadd.f32 %v2987_v12, %v685_v13 }
  0xf4   : > { %v765_v16 = vadd.f32 %v2993_v11, %v764_v14  ;;  %v3331_v17 = vpop.f32.mrb[1].mxu1  ;;  %v688_v18 = vpop.f32.mrb[2].mxu0  ;;  %v3047_v15 = vld [vmem:[%s4320_s6 + $0x1] ss:$0 sm:$0xff] }
  0xf5   : > { %v767_v20 = vpop.f32.mrb[2].mxu1  ;;  %v3320_v21 = vpop.f32.mrb[3].mxu0 }
  0xf6   : > { %v3332_v22 = vpop.f32.mrb[3].mxu1  ;;  %3346 = vmatpush3.xpose.msk.msra.mxu1 %vm849_vm2, %v765_v16 }
  0xf7   : > { %3350 = vmatprep.subr.mxu1 %v3676_v1 }
  0xf9   : > { %3348 = vmatmul.mubr.msk.f32.vlgmr.msra.gmra.mrb[4].mxu1 %vm849_vm2, %v686_v19 }
  0xfa   : > { %3352 = vmatprep.mubr.msk.f32.mxu1 %vm3677_vm0, %v3676_v1 }
 0x103   : > { %v843_v39 = vpop.f32.mrb[4].mxu0 }
 0x104   : > { %v3343_v41 = vpop.f32.mrb[5].mxu0  ;;  %v844_v45 = vadd.f32 %v2999_v43, %v843_v39  ;;  %v3586_v39 = vld [vmem:[%s4321_s7 + $0x8] sm:$0xff]   ;;  %v3591_v43 = vld [vmem:[%s4342_s23 + $0x58] sm:$0xff]  }
 0x105   : > { %v846_v42 = vpop.f32.mrb[6].mxu0  ;;  %v3587_v41 = vld [vmem:[%s4342_s23 + $0x48] sm:$0xff]  }
 0x106   : > { %v3344_v44 = vpop.f32.mrb[7].mxu0  ;;  %3351 = vmatpush3.msra.mxu1 %v844_v45  ;;  %v3589_v42 = vld [vmem:[%s4342_s23 + $0x50] sm:$0xff]   ;;  %v3588_v45 = vld [vmem:[%s4341_s1 + $0x40] sm:$0xff]  }
 0x107   : > { %3355 = vmatprep.subr.bf16.mxu1 %v3676_v1 }
 0x113   : > { %v1171_v61 = vpop.f32.mrb[8].mxu0 }
 0x114   : > { %v1172_v62 = vadd.f32 %v3032_v60, %v1171_v61  ;;  %v3377_v63 = vpop.f32.mrb[9].mxu0 }
 0x115   : > { %v1174_v0 = vpop.f32.mrb[10].mxu0 }
 0x116   : > { %v3378_v2 = vpop.f32.mrb[11].mxu0 }
 0x1cc   : > { %v922_v30 = vpop.f32.mrb[4].mxu1 }
 0x1cd   : > { %v926_v31 = vsel %vm607_vm3, %v922_v30, -1e+30  ;;  %v3349_v32 = vpop.f32.mrb[5].mxu1 }
 0x1ce   : > { %v928_v33 = vsel %vm927_vm4, %v926_v31, -inf }
 0x1cf   : > { %929 = vmax.xlane.f32.xlu0 %v928_v33 }
 0x25c   : > { %v930_v34 = vpop.xlane.xlu0 %929 }
 0x25d   : > { %v931_v35 = vsub.f32 %v926_v31, %v930_v34 }
 0x25f   : > { %v932_v36 = vmul.f32 1.442695, %v931_v35 }
 0x261   : > { %3648 = vpow2.f32 %v932_v36  ;;  %v3585_v36 = vld [vmem:[%s4342_s23 + $0x40] sm:$0xff]  }
 0x26b   : > { %v3649_v37 = vpop.eup %3648 }
 0x26c   : > { %v934_v38 = vsel %vm927_vm4, %v3649_v37, 0.0 }
 0x26d   : > { %935 = vadd.xlane.f32.xlu0 %v934_v38 }
 0x2fa   : > { %v936_v49 = vpop.xlane.xlu0 %935 }
 0x2fb   : > { %3650 = vrcp.f32 %v936_v49  ;;  %v3592_v49 = vld [vmem:[%s4341_s1 + $0x50] sm:$0xff]  }
 0x305   : > { %v3651_v50 = vpop.eup %3650 }
 0x306   : > { %v938_v52 = vmul.f32 %v3651_v50, %v3649_v37  ;;  %v3593_v50 = vld [vmem:[%s4341_s1 + $0x58] sm:$0xff]  }
 0x308   : > { %3353 = vmatmul.mubr.msk.f32.vlgmr.msra.gmra.mrb[6].mxu1 %vm927_vm4, %v938_v52 }
 0x309   : > { %3356 = vmatpush3.bf16.msra.mxu1 %v3574_v51  ;;  %3363 = vmatprep.mubr.msk.bf16.mxu1 %vm3677_vm0, %v3676_v1  ;;  %v3086_v51 = vld [vmem:[%s4318_s4 + $0x2] ss:$0 sm:$0xff] }
 0x30a   : > { %3357 = vmatprep.subr.bf16.mxu1 %v3676_v1 }
 0x30d   : > { %3358 = vmatpush3.bf16.msra.mxu1 %v3576_v53 }
 0x30e   : > { %3359 = vmatprep.subr.bf16.mxu1 %v3676_v1 }
 0x311   : > { %3360 = vmatpush3.bf16.msra.mxu1 %v3578_v54 }
 0x312   : > { %3361 = vmatprep.subr.bf16.mxu1 %v3676_v1 }
 0x315   : > { %3362 = vmatpush3.bf16.msra.mxu1 %v3579_v55 }
 0x316   : > { %3379 = vmatprep.subr.bf16.mxu1 %v3676_v1 }
 0x318   : > { %3364 = vmatmul.mubr.msk.bf16.vlgmr.msra.gmra.mrb[8].mxu1 %vm647_vm1, %v3833_v10 }
 0x319   : > { %3380 = vmatpush3.bf16.msra.mxu1 %v3580_v56  ;;  %3387 = vmatprep.mubr.msk.bf16.mxu1 %vm3677_vm0, %v3676_v1 }
 0x31a   : > { %3381 = vmatprep.subr.bf16.mxu1 %v3676_v1 }
 0x31d   : > { %3382 = vmatpush3.bf16.msra.mxu1 %v3581_v57 }
 0x31e   : > { %3383 = vmatprep.subr.bf16.mxu1 %v3676_v1 }
 0x321   : > { %3384 = vmatpush3.bf16.msra.mxu1 %v3582_v58 }
 0x322   : > { %3385 = vmatprep.subr.bf16.mxu1 %v3676_v1 }
 0x325   : > { %3386 = vmatpush3.bf16.msra.mxu1 %v3583_v59 }
 0x326   : > { %3391 = vmatprep.subr.mxu1 %v3676_v1 }
 0x328   : > { %3388 = vmatmul.mubr.msk.bf16.vlgmr.msra.gmra.mrb[12].mxu1 %vm647_vm1, %v3833_v10 }
 0x329   : > { %3393 = vmatprep.mubr.msk.f32.mxu1 %vm3677_vm0, %v3676_v1 }
 0x32e   : > { %3392 = vmatpush3.xpose.msk.msra.mxu1 %vm849_vm2, %v1172_v62  ;;  %v3071_v62 = vld [vmem:[%s4344_s2 + $0x2] ss:$0 sm:$0xff] }
 0x32f   : > { %3407 = vmatprep.subr.bf16.mxu1 %v3676_v1 }
 0x3db   : > { %v1008_v3 = vpop.f32.mrb[6].mxu1 }
 0x3dc   : > { %v3354_v4 = vpop.f32.mrb[7].mxu1  ;;  %v1012_v14 = vpack.c.bf16 %v1008_v3, %v1008_v3 }
 0x3eb   : > { %v1090_v6 = vpop.f32.mrb[8].mxu1 }
 0x3ec   : > { %v1091_v9 = vadd.f32 %v3017_v5, %v1090_v6  ;;  %v3365_v11 = vpop.f32.mrb[9].mxu1  ;;  %v3594_v5 = vld [vmem:[%s4319_s5 + $0x40] sm:$0xff]   ;;  %v3595_v6 = vld [vmem:[%s4319_s5 + $0x48] sm:$0xff]  }
 0x3ed   : > { %v1093_v12 = vpop.f32.mrb[10].mxu1 }
 0x3ee   : > { %v3366_v13 = vpop.f32.mrb[11].mxu1  ;;  %3394 = vmatmul.mubr.msk.f32.vlgmr.msra.gmra.mrb[16].mxu1 %vm849_vm2, %v1091_v9  ;;  %v3597_v9 = vld [vmem:[%s4319_s5 + $0x58] sm:$0xff]  }
 0x3ef   : > { %3408 = vmatpush3.bf16.msra.mxu1 %v3584_v7  ;;  %3409 = vmatprep.mubr.msk.bf16.mxu1 %vm3677_vm0, %v3676_v1  ;;  %v3596_v7 = vld [vmem:[%s4319_s5 + $0x50] sm:$0xff]  }
 0x3f0   : > { %3425 = vmatprep.subr.bf16.mxu1 %v3676_v1 }
 0x3f2   : > { %3410 = vmatmul.mubr.msk.bf16.vlgmr.msra.gmra.mrb[20].mxu1 %vm849_vm2, %v1012_v14 }
 0x3f3   : > { %3433 = vmatprep.mubr.msk.bf16.mxu1 %vm3677_vm0, %v3676_v1  ;;  %3426 = vmatpush3.bf16.msra.mxu1 %v3585_v36 }
 0x3f4   : > { %3427 = vmatprep.subr.bf16.mxu1 %v3676_v1 }
 0x3f7   : > { %3428 = vmatpush3.bf16.msra.mxu1 %v3587_v41  ;;  %v3603_v41 = vld [vmem:[%s4342_s23 + $0x70] sm:$0xff]  }
 0x3f8   : > { %3429 = vmatprep.subr.bf16.mxu1 %v3676_v1 }
 0x3fb   : > { %v1252_v16 = vpop.f32.mrb[12].mxu1  ;;  %3430 = vmatpush3.bf16.msra.mxu1 %v3589_v42  ;;  %v3605_v42 = vld [vmem:[%s4342_s23 + $0x78] sm:$0xff]  }
 0x3fc   : > { %v1253_v17 = vadd.f32 %v3047_v15, %v1252_v16  ;;  %v3389_v18 = vpop.f32.mrb[13].mxu1  ;;  %3431 = vmatprep.subr.bf16.mxu1 %v3676_v1 }
 0x3fd   : > { %v1255_v19 = vpop.f32.mrb[14].mxu1 }
 0x3fe   : > { %v3390_v20 = vpop.f32.mrb[15].mxu1  ;;  %3397 = vmatpush3.msra.mxu0 %v1253_v17 }
 0x3ff   : > { %3401 = vmatprep.subr.bf16.mxu0 %v3676_v1  ;;  %3432 = vmatpush3.bf16.msra.mxu1 %v3591_v43 }
 0x400   : > { %3449 = vmatprep.subr.mxu1 %v3676_v1 }
 0x402   : > { %3434 = vmatmul.mubr.msk.bf16.vlgmr.msra.gmra.mrb[24].mxu1 %vm647_vm1, %v3833_v10 }
 0x403   : > { %3451 = vmatprep.mubr.msk.f32.mxu1 %vm3677_vm0, %v3676_v1 }
 0x4c1   : > { %v1330_v21 = vpop.f32.mrb[16].mxu1 }
 0x4c2   : > { %v1334_v22 = vsel %vm607_vm3, %v1330_v21, -1e+30  ;;  %v3395_v23 = vpop.f32.mrb[17].mxu1 }
 0x4c3   : > { %v1335_v24 = vsel %vm927_vm4, %v1334_v22, -inf  ;;  %v3101_v23 = vld [vmem:[%s4320_s6 + $0x2] ss:$0 sm:$0xff] }
 0x4c4   : > { %1336 = vmax.xlane.f32.xlu1 %v1335_v24 }
 0x4c5   : > { %v1515_v25 = vpop.f32.mrb[20].mxu1 }
 0x4c6   : > { %v3411_v26 = vpop.f32.mrb[21].mxu1 }
 0x4c7   : > { %v1518_v27 = vpop.f32.mrb[22].mxu1 }
 0x4c8   : > { %v3412_v30 = vpop.f32.mrb[23].mxu1 }
 0x4c9   : > { %v3598_v30 = vld [vmem:[%s4321_s7 + $0x10] sm:$0xff]  }
 0x4d5   : > { %v1677_v52 = vpop.f32.mrb[24].mxu1 }
 0x4d6   : > { %v1678_v53 = vadd.f32 %v3086_v51, %v1677_v52  ;;  %v3435_v54 = vpop.f32.mrb[25].mxu1  ;;  %v3138_v52 = vld [vmem:[%s4318_s4 + $0x3] ss:$0 sm:$0xff] }
 0x4d7   : > { %v1680_v55 = vpop.f32.mrb[26].mxu1 }
 0x4d8   : > { %v3436_v56 = vpop.f32.mrb[27].mxu1  ;;  %3450 = vmatpush3.xpose.msk.msra.mxu1 %vm849_vm2, %v1678_v53  ;;  %v3123_v53 = vld [vmem:[%s4344_s2 + $0x3] ss:$0 sm:$0xff] }
 0x4d9   : > { %3454 = vmatprep.subr.mxu1 %v3676_v1 }
 0x551   : > { %v1337_v31 = vpop.xlane.xlu1 %1336 }
 0x552   : > { %v1338_v32 = vsub.f32 %v1334_v22, %v1337_v31 }
 0x554   : > { %v1339_v33 = vmul.f32 1.442695, %v1338_v32  ;;  %v3600_v32 = vld [vmem:[%s4341_s1 + $0x60] sm:$0xff]  }
 0x556   : > { %3652 = vpow2.f32 %v1339_v33  ;;  %v3602_v33 = vld [vmem:[%s4341_s1 + $0x68] sm:$0xff]  }
 0x560   : > { %v3653_v34 = vpop.eup %3652 }
 0x561   : > { %v1341_v35 = vsel %vm927_vm4, %v3653_v34, 0.0 }
 0x562   : > { %1342 = vadd.xlane.f32.xlu1 %v1341_v35  ;;  %v3606_v35 = vld [vmem:[%s4341_s1 + $0x78] sm:$0xff]  }
 0x5ef   : > { %v1343_v37 = vpop.xlane.xlu1 %1342 }
 0x5f0   : > { %3654 = vrcp.f32 %v1343_v37  ;;  %v3599_v37 = vld [vmem:[%s4342_s23 + $0x60] sm:$0xff]  }
 0x5fa   : > { %v3655_v38 = vpop.eup %3654 }
 0x5fb   : > { %v1345_v40 = vmul.f32 %v3655_v38, %v3653_v34  ;;  %v3604_v34 = vld [vmem:[%s4341_s1 + $0x70] sm:$0xff]  }
 0x5fd   : > { %3399 = vmatmul.mubr.msk.f32.vlgmr.msra.gmra.mrb[12].mxu0 %vm927_vm4, %v1345_v40  ;;  %v3601_v40 = vld [vmem:[%s4342_s23 + $0x68] sm:$0xff]  }
 0x5fe   : > { %3402 = vmatpush3.bf16.msra.mxu0 %v3586_v39  ;;  %3403 = vmatprep.mubr.msk.bf16.mxu0 %vm3677_vm0, %v3676_v1 }
 0x5ff   : > { %3413 = vmatprep.subr.bf16.mxu0 %v3676_v1 }
 0x6d0   : > { %v1415_v44 = vpop.f32.mrb[12].mxu0 }
 0x6d1   : > { %v1419_v46 = vpack.c.bf16 %v1415_v44, %v1415_v44  ;;  %v3400_v47 = vpop.f32.mrb[13].mxu0 }
 0x6d3   : > { %3404 = vmatmul.mubr.msk.bf16.vlgmr.msra.gmra.mrb[16].mxu0 %vm849_vm2, %v1419_v46 }
 0x6d4   : > { %3414 = vmatpush3.bf16.msra.mxu0 %v3588_v45  ;;  %3421 = vmatprep.mubr.msk.bf16.mxu0 %vm3677_vm0, %v3676_v1 }
 0x6d5   : > { %3415 = vmatprep.subr.bf16.mxu0 %v3676_v1 }
 0x6d8   : > { %3416 = vmatpush3.bf16.msra.mxu0 %v3590_v48 }
 0x6d9   : > { %3417 = vmatprep.subr.bf16.mxu0 %v3676_v1 }
 0x6dc   : > { %3418 = vmatpush3.bf16.msra.mxu0 %v3592_v49 }
 0x6dd   : > { %3419 = vmatprep.subr.bf16.mxu0 %v3676_v1 }
 0x6e0   : > { %3420 = vmatpush3.bf16.msra.mxu0 %v3593_v50 }
 0x6e1   : > { %3437 = vmatprep.subr.bf16.mxu0 %v3676_v1 }
 0x6e3   : > { %3422 = vmatmul.mubr.msk.bf16.vlgmr.msra.gmra.mrb[20].mxu0 %vm647_vm1, %v3833_v10 }
 0x6e4   : > { %3445 = vmatprep.mubr.msk.bf16.mxu0 %vm3677_vm0, %v3676_v1  ;;  %3438 = vmatpush3.bf16.msra.mxu0 %v3594_v5 }
 0x6e5   : > { %3439 = vmatprep.subr.bf16.mxu0 %v3676_v1 }
 0x6e8   : > { %3440 = vmatpush3.bf16.msra.mxu0 %v3595_v6 }
 0x6e9   : > { %3441 = vmatprep.subr.bf16.mxu0 %v3676_v1 }
 0x6ec   : > { %3442 = vmatpush3.bf16.msra.mxu0 %v3596_v7 }
 0x6ed   : > { %3443 = vmatprep.subr.bf16.mxu0 %v3676_v1 }
 0x6f0   : > { %3444 = vmatpush3.bf16.msra.mxu0 %v3597_v9 }
 0x6f1   : > { %3465 = vmatprep.subr.bf16.mxu0 %v3676_v1 }
 0x6f3   : > { %3446 = vmatmul.mubr.msk.bf16.vlgmr.msra.gmra.mrb[24].mxu0 %vm647_vm1, %v3833_v10 }
 0x6f4   : > { %3473 = vmatprep.mubr.msk.bf16.mxu0 %vm3677_vm0, %v3676_v1  ;;  %3466 = vmatpush3.bf16.msra.mxu0 %v3600_v32 }
 0x6f5   : > { %3467 = vmatprep.subr.bf16.mxu0 %v3676_v1 }
 0x6f8   : > { %3468 = vmatpush3.bf16.msra.mxu0 %v3602_v33 }
 0x6f9   : > { %3469 = vmatprep.subr.bf16.mxu0 %v3676_v1 }
 0x6fc   : > { %3470 = vmatpush3.bf16.msra.mxu0 %v3604_v34 }
 0x6fd   : > { %3471 = vmatprep.subr.bf16.mxu0 %v3676_v1 }
 0x700   : > { %3472 = vmatpush3.bf16.msra.mxu0 %v3606_v35 }
 0x701   : > { %3489 = vmatprep.subr.bf16.mxu0 %v3676_v1 }
 0x703   : > { %3474 = vmatmul.mubr.msk.bf16.vlgmr.msra.gmra.mrb[28].mxu0 %vm647_vm1, %v3833_v10 }
 0x704   : > { %3497 = vmatprep.mubr.msk.bf16.mxu0 %vm3677_vm0, %v3676_v1 }
 0x7a6   : > { %v1466_v57 = vpop.f32.mrb[16].mxu0 }
 0x7a7   : > { %v4036_v58 = vadd.f32 %v1515_v25, %v1466_v57  ;;  %v3405_v59 = vpop.f32.mrb[17].mxu0 }
 0x7a8   : > { %v1469_v60 = vpop.f32.mrb[18].mxu0 }
 0x7a9   : > { %v3406_v61 = vpop.f32.mrb[19].mxu0 }
 0x7aa   : > { %v3608_v61 = vld [vmem:[%s4319_s5 + $0x68] sm:$0xff]  }
 0x7b6   : > { %v1596_v63 = vpop.f32.mrb[20].mxu0 }
 0x7b7   : > { %v1597_v0 = vadd.f32 %v3071_v62, %v1596_v63  ;;  %v3423_v2 = vpop.f32.mrb[21].mxu0  ;;  %v3609_v62 = vld [vmem:[%s4319_s5 + $0x70] sm:$0xff]   ;;  %v3610_v63 = vld [vmem:[%s4319_s5 + $0x78] sm:$0xff]  }
 0x7b8   : > { %v1599_v3 = vpop.f32.mrb[22].mxu0 }
 0x7b9   : > { %v3424_v4 = vpop.f32.mrb[23].mxu0  ;;  %3452 = vmatmul.mubr.msk.f32.vlgmr.msra.gmra.mrb[18].mxu1 %vm849_vm2, %v1597_v0 }
 0x7ba   : > { %3456 = vmatprep.mubr.msk.f32.mxu1 %vm3677_vm0, %v3676_v1 }
 0x7c6   : > { %v1758_v20 = vpop.f32.mrb[24].mxu0 }
 0x7c7   : > { %v3447_v21 = vpop.f32.mrb[25].mxu0  ;;  %v1759_v25 = vadd.f32 %v3101_v23, %v1758_v20 }
 0x7c8   : > { %v1761_v22 = vpop.f32.mrb[26].mxu0 }
 0x7c9   : > { %v3448_v24 = vpop.f32.mrb[27].mxu0  ;;  %3455 = vmatpush3.msra.mxu1 %v1759_v25 }
 0x7ca   : > { %3459 = vmatprep.subr.bf16.mxu1 %v3676_v1  ;;  %v3166_v24 = vld [vmem:[%s4322_s8] ss:$0 sm:$0xff] }
 0x7d6   : > { %v2054_v43 = vpop.f32.mrb[28].mxu0 }
 0x7d7   : > { %v3475_v44 = vpop.f32.mrb[29].mxu0  ;;  %v2055_v59 = vadd.f32 %v3123_v53, %v2054_v43  ;;  %v3617_v43 = vld [vmem:[%s4327_s13 + $0x8] sm:$0xff]  }
 0x7d8   : > { %v2057_v45 = vpop.f32.mrb[30].mxu0  ;;  %v3618_v44 = vld [vmem:[%s4327_s13 + $0x10] sm:$0xff]  }
 0x7d9   : > { %v3476_v46 = vpop.f32.mrb[31].mxu0  ;;  %v3619_v45 = vld [vmem:[%s4327_s13 + $0x18] sm:$0xff]  }
 0x7da   : > { %v3620_v46 = vld [vmem:[%s4327_s13 + $0x20] sm:$0xff]  }
 0x88c   : > { %v1836_v11 = vpop.f32.mrb[18].mxu1 }
 0x88d   : > { %v1840_v12 = vsel %vm607_vm3, %v1836_v11, -1e+30  ;;  %v3453_v13 = vpop.f32.mrb[19].mxu1 }
 0x88e   : > { %v1841_v14 = vsel %vm927_vm4, %v1840_v12, -inf }
 0x88f   : > { %1842 = vmax.xlane.f32.xlu0 %v1841_v14 }
 0x91c   : > { %v1843_v15 = vpop.xlane.xlu0 %1842 }
 0x91d   : > { %v1844_v16 = vsub.f32 %v1840_v12, %v1843_v15 }
 0x91f   : > { %v1845_v17 = vmul.f32 1.442695, %v1844_v16 }
 0x921   : > { %3656 = vpow2.f32 %v1845_v17 }
 0x92b   : > { %v3657_v18 = vpop.eup %3656 }
 0x92c   : > { %v1847_v19 = vsel %vm927_vm4, %v3657_v18, 0.0 }
 0x92d   : > { %1848 = vadd.xlane.f32.xlu1 %v1847_v19  ;;  %v3611_v19 = vld [vmem:[%s4321_s7 + $0x18] sm:$0xff]  }
 0x9ba   : > { %v1849_v26 = vpop.xlane.xlu1 %1848 }
 0x9bb   : > { %3658 = vrcp.f32 %v1849_v26 }
 0x9c5   : > { %v3659_v27 = vpop.eup %3658 }
 0x9c6   : > { %v1851_v31 = vmul.f32 %v3659_v27, %v3657_v18 }
 0x9c8   : > { %3457 = vmatmul.mubr.msk.f32.vlgmr.msra.gmra.mrb[28].mxu1 %vm927_vm4, %v1851_v31 }
 0x9c9   : > { %3460 = vmatpush3.bf16.msra.mxu1 %v3598_v30  ;;  %3461 = vmatprep.mubr.msk.bf16.mxu1 %vm3677_vm0, %v3676_v1 }
 0x9ca   : > { %3477 = vmatprep.subr.bf16.mxu1 %v3676_v1 }
 0xa9b   : > { %v1921_v36 = vpop.f32.mrb[28].mxu1 }
 0xa9c   : > { %v1925_v38 = vpack.c.bf16 %v1921_v36, %v1921_v36  ;;  %v3458_v39 = vpop.f32.mrb[29].mxu1 }
 0xa9d   : > { %v3612_v39 = vld [vmem:[%s4325_s11] sm:$0xff]  }
 0xa9e   : > { %3462 = vmatmul.mubr.msk.bf16.vlgmr.msra.gmra.mrb[32].mxu1 %vm849_vm2, %v1925_v38 }
 0xa9f   : > { %3478 = vmatpush3.bf16.msra.mxu1 %v3599_v37  ;;  %3485 = vmatprep.mubr.msk.bf16.mxu1 %vm3677_vm0, %v3676_v1 }
 0xaa0   : > { %3479 = vmatprep.subr.bf16.mxu1 %v3676_v1 }
 0xaa3   : > { %3480 = vmatpush3.bf16.msra.mxu1 %v3601_v40  ;;  %v3614_v40 = vld [vmem:[%s4325_s11 + $0x10] sm:$0xff]  }
 0xaa4   : > { %3481 = vmatprep.subr.bf16.mxu1 %v3676_v1 }
 0xaa7   : > { %3482 = vmatpush3.bf16.msra.mxu1 %v3603_v41  ;;  %v3615_v41 = vld [vmem:[%s4325_s11 + $0x18] sm:$0xff]  }
 0xaa8   : > { %3483 = vmatprep.subr.bf16.mxu1 %v3676_v1 }
 0xaab   : > { %3484 = vmatpush3.bf16.msra.mxu1 %v3605_v42  ;;  %v3616_v42 = vld [vmem:[%s4327_s13] sm:$0xff]  }
 0xaac   : > { %3501 = vmatprep.subr.mxu1 %v3676_v1 }
 0xaae   : > { %3486 = vmatmul.mubr.msk.bf16.vlgmr.msra.gmra.mrb[36].mxu1 %vm647_vm1, %v3833_v10 }
 0xaaf   : > { %3503 = vmatprep.mubr.msk.f32.mxu1 %vm3677_vm0, %v3676_v1 }
 0xb71   : > { %v1972_v47 = vpop.f32.mrb[32].mxu1 }
 0xb72   : > { %v4124_v48 = vadd.f32 %v1972_v47, %v4036_v58  ;;  %v3463_v49 = vpop.f32.mrb[33].mxu1  ;;  %v3607_v58 = vld [vmem:[%s4319_s5 + $0x60] sm:$0xff]   ;;  %v3621_v47 = vld [vmem:[%s4327_s13 + $0x28] sm:$0xff]  }
 0xb73   : > { %v1975_v50 = vpop.f32.mrb[34].mxu1  ;;  %3490 = vmatpush3.bf16.msra.mxu0 %v3607_v58  ;;  %v3169_v58 = vld [vmem:[%s4326_s12] ss:$0 sm:$0xff] }
 0xb74   : > { %v3464_v51 = vpop.f32.mrb[35].mxu1  ;;  %3491 = vmatprep.subr.bf16.mxu0 %v3676_v1 }
 0xb77   : > { %3492 = vmatpush3.bf16.msra.mxu0 %v3608_v61 }
 0xb78   : > { %3493 = vmatprep.subr.bf16.mxu0 %v3676_v1 }
 0xb7b   : > { %3494 = vmatpush3.bf16.msra.mxu0 %v3609_v62 }
 0xb7c   : > { %3495 = vmatprep.subr.bf16.mxu0 %v3676_v1 }
 0xb7f   : > { %3496 = vmatpush3.bf16.msra.mxu0 %v3610_v63 }
 0xb80   : > { %3517 = vmatprep.subr.bf16.mxu0 %v3676_v1 }
 0xb81   : > { %v2135_v54 = vpop.f32.mrb[36].mxu1 }
 0xb82   : > { %v2136_v55 = vadd.f32 %v3138_v52, %v2135_v54  ;;  %v3487_v56 = vpop.f32.mrb[37].mxu1  ;;  %3498 = vmatmul.mubr.msk.bf16.vlgmr.msra.gmra.mrb[32].mxu0 %vm647_vm1, %v3833_v10  ;;  %v3167_v52 = vld [vmem:[%s4323_s9] ss:$0 sm:$0xff] }
 0xb83   : > { %v2138_v57 = vpop.f32.mrb[38].mxu1  ;;  %3525 = vmatprep.mubr.msk.bf16.mxu0 %vm3677_vm0, %v3676_v1  ;;  %3518 = vmatpush3.bf16.msra.mxu0 %v3612_v39  ;;  %v3168_v54 = vld [vmem:[%s4324_s10] ss:$0 sm:$0xff] }
 0xb84   : > { %v3488_v60 = vpop.f32.mrb[39].mxu1  ;;  %3502 = vmatpush3.xpose.msk.msra.mxu1 %vm849_vm2, %v2136_v55  ;;  %3519 = vmatprep.subr.bf16.mxu0 %v3676_v1 }
 0xb85   : > { %3506 = vmatprep.subr.mxu1 %v3676_v1  ;;  %v3623_v60 = vld [vmem:[%s4327_s13 + $0x38] sm:$0xff]  }
 0xb87   : > { %3504 = vmatmul.mubr.msk.f32.vlgmr.msra.gmra.mrb[30].mxu1 %vm849_vm2, %v2055_v59  ;;  %v3622_v59 = vld [vmem:[%s4327_s13 + $0x30] sm:$0xff]  }
 0xb88   : > { %3508 = vmatprep.mubr.msk.f32.mxu1 %vm3677_vm0, %v3676_v1 }
 0xc55   : > { %v2216_v10 = vpop.f32.mrb[32].mxu0 }
 0xc56   : > { %v3499_v12 = vpop.f32.mrb[33].mxu0  ;;  %v2217_v15 = vadd.f32 %v3153_v29, %v2216_v10 }
 0xc57   : > { %v2219_v13 = vpop.f32.mrb[34].mxu0 }
 0xc58   : > { %v3500_v14 = vpop.f32.mrb[35].mxu0  ;;  %3507 = vmatpush3.msra.mxu1 %v2217_v15 }
 0xc59   : > { %3511 = vmatprep.subr.bf16.mxu1 %v3676_v1 }
 0xc5a   : > { %v2294_v0 = vpop.f32.mrb[30].mxu1 }
 0xc5b   : > { %v2298_v2 = vsel %vm607_vm3, %v2294_v0, -1e+30  ;;  %v3505_v3 = vpop.f32.mrb[31].mxu1 }
 0xc5c   : > { %v2299_v4 = vsel %vm927_vm4, %v2298_v2, -inf }
 0xc5d   : > { %2300 = vmax.xlane.f32.xlu0 %v2299_v4 }
 0xcea   : > { %v2301_v5 = vpop.xlane.xlu0 %2300 }
 0xceb   : > { %v2302_v6 = vsub.f32 %v2298_v2, %v2301_v5 }
 0xced   : > { %v2303_v7 = vmul.f32 1.442695, %v2302_v6 }
 0xcef   : > { %3660 = vpow2.f32 %v2303_v7 }
 0xcf9   : > { %v3661_v9 = vpop.eup %3660 }
 0xcfa   : > { %v2305_v11 = vsel %vm927_vm4, %v3661_v9, 0.0 }
 0xcfb   : > { %2306 = vadd.xlane.f32.xlu1 %v2305_v11 }
 0xd88   : > { %v2307_v16 = vpop.xlane.xlu1 %2306 }
 0xd89   : > { %3662 = vrcp.f32 %v2307_v16 }
 0xd93   : > { %v3663_v17 = vpop.eup %3662 }
 0xd94   : > { %v2309_v18 = vmul.f32 %v3663_v17, %v3661_v9  ;;  %v3626_v17 = vld [vmem:[%s4331_s17 + $0x4] ss:$16 sps:$4 sm:$0xff]  }
 0xd96   : > { %3509 = vmatmul.mubr.msk.f32.vlgmr.msra.gmra.mrb[40].mxu1 %vm927_vm4, %v2309_v18  ;;  %v3624_v18 = vld [vmem:[%s4331_s17] ss:$16 sps:$4 sm:$0xff]  }
 0xd97   : > { %3513 = vmatprep.mubr.msk.bf16.mxu1 %vm3677_vm0, %v3676_v1  ;;  %3512 = vmatpush3.bf16.msra.mxu1 %v3611_v19  ;;  %v3629_v19 = vld [vmem:[%s4331_s17 + $0x24] ss:$16 sps:$4 sm:$0xff]  }
 0xd98   : > { %3529 = vmatprep.subr.bf16.mxu1 %v3676_v1 }
 0xe69   : > { %v2379_v20 = vpop.f32.mrb[40].mxu1 }
 0xe6a   : > { %v2383_v21 = vpack.c.bf16 %v2379_v20, %v2379_v20  ;;  %v3510_v22 = vpop.f32.mrb[41].mxu1  ;;  %v3627_v20 = vld [vmem:[%s4331_s17 + $0x20] ss:$16 sps:$4 sm:$0xff]  }
 0xe6b   : > { %v3630_v22 = vld [vmem:[%s4331_s17 + $0x40] ss:$16 sps:$4 sm:$0xff]  }
 0xe6c   : > { %3514 = vmatmul.mubr.msk.bf16.vlgmr.msra.gmra.mrb[44].mxu1 %vm849_vm2, %v2383_v21  ;;  %v3632_v21 = vld [vmem:[%s4331_s17 + $0x44] ss:$16 sps:$4 sm:$0xff]  }
 0xe6d   : > { %3545 = vmatprep.mubr.msk.bf16.mxu1 %vm3677_vm0, %v3676_v1  ;;  %3530 = vmatpush3.bf16.msra.mxu1 %v3616_v42  ;;  %v3642_v42 = vld [vmem:[%s4331_s17 + $0x48] ss:$16 sps:$4 sm:$0xff]  }
 0xe6e   : > { %3531 = vmatprep.subr.bf16.mxu1 %v3676_v1 }
 0xe71   : > { %3532 = vmatpush3.bf16.msra.mxu1 %v3617_v43  ;;  %v3647_v43 = vld [vmem:[%s4331_s17 + $0x6c] ss:$16 sps:$4 sm:$0xff]  }
 0xe72   : > { %3533 = vmatprep.subr.bf16.mxu1 %v3676_v1 }
 0xe75   : > { %3534 = vmatpush3.bf16.msra.mxu1 %v3618_v44  ;;  %v3645_v44 = vld [vmem:[%s4331_s17 + $0x68] ss:$16 sps:$4 sm:$0xff]  }
 0xe76   : > { %3535 = vmatprep.subr.bf16.mxu1 %v3676_v1 }
 0xe79   : > { %3536 = vmatpush3.bf16.msra.mxu1 %v3619_v45  ;;  %v2723_v45 = vsub.s32 0, %v3876_v28 }
 0xe7a   : > { %3537 = vmatprep.subr.bf16.mxu1 %v3676_v1 }
 0xe7d   : > { %3538 = vmatpush3.bf16.msra.mxu1 %v3620_v46  ;;  %v2719_v46 = vld [vmem:[%s4332_s18] sm:$0xf] }
 0xe7e   : > { %3539 = vmatprep.subr.bf16.mxu1 %v3676_v1 }
 0xe81   : > { %3540 = vmatpush3.bf16.msra.mxu1 %v3621_v47  ;;  %v2727_v47 = vsub.s32 1, %v3876_v28 }
 0xe82   : > { %3541 = vmatprep.subr.bf16.mxu1 %v3676_v1 }
 0xe85   : > { %3542 = vmatpush3.bf16.msra.mxu1 %v3622_v59  ;;  %v2735_v59 = vsub.s32 3, %v3876_v28 }
 0xe86   : > { %3543 = vmatprep.subr.bf16.mxu1 %v3676_v1 }
 0xe89   : > { %3544 = vmatpush3.bf16.msra.mxu1 %v3623_v60 }
 0xf3f   : > { %v2430_v23 = vpop.f32.mrb[44].mxu1 }
 0xf40   : > { %v2436_v25 = vadd.f32 %v2430_v23, %v4124_v48  ;;  %v3515_v26 = vpop.f32.mrb[45].mxu1  ;;  %v3635_v23 = vld [vmem:[%s4331_s17 + $0x64] ss:$16 sps:$4 sm:$0xff]  }
 0xf41   : > { %v2433_v27 = vpop.f32.mrb[46].mxu1  ;;  %v3638_v26 = vld [vmem:[%s4331_s17 + $0xc] ss:$16 sps:$4 sm:$0xff]  }
 0xf42   : > { %v2444_v30 = vadd.f32 %v3166_v24, %v2436_v25  ;;  %v3516_v31 = vpop.f32.mrb[47].mxu1  ;;  %v3633_v24 = vld [vmem:[%s4331_s17 + $0x60] ss:$16 sps:$4 sm:$0xff]   ;;  %v3678_v25 = vmov 0  }
 0xf44   : > { %v2445_v32 = vadd.f32 %v2444_v30, %v3824_v8  ;;  %v3613_v8 = vld [vmem:[%s4325_s11 + $0x8] sm:$0xff]  }
 0xf45   : > { %3520 = vmatpush3.bf16.msra.mxu0 %v3613_v8  ;;  %v3641_v8 = vld [vmem:[%s4331_s17 + $0x2c] ss:$16 sps:$4 sm:$0xff]  }
 0xf46   : > { %v2448_v33 = vsel %vm647_vm1, %v2445_v32, 0.0  ;;  %3521 = vmatprep.subr.bf16.mxu0 %v3676_v1 }
 0xf47   : > { %2449 = vadd.xlane.f32.xlu0 %v2448_v33  ;;  %v3184_v33 = vld [vmem:[%s4329_s15] ss:$0 sm:$0xff] }
 0xf49   : > { %3522 = vmatpush3.bf16.msra.mxu0 %v3614_v40  ;;  %v3639_v40 = vld [vmem:[%s4331_s17 + $0x28] ss:$16 sps:$4 sm:$0xff]  }
 0xf4a   : > { %3523 = vmatprep.subr.bf16.mxu0 %v3676_v1  ;;  %v3175_v1 = vld [vmem:[%s4328_s14] ss:$0 sm:$0xff] }
 0xf4d   : > { %3524 = vmatpush3.bf16.msra.mxu0 %v3615_v41  ;;  %v3644_v41 = vld [vmem:[%s4331_s17 + $0x4c] ss:$16 sps:$4 sm:$0xff]  }
 0xf4e   : > { %2824 = vmatprep.subr.bf16.mxu0 %v3626_v17 }
 0xfd4   : > { %v2450_v34 = vpop.xlane.xlu0 %2449 }
 0xfd5   : > { %v2452_v35 = vmul.f32 0.015625, %v2450_v34 }
 0xfd7   : > { %v2453_v36 = vsub.f32 %v2445_v32, %v2452_v35  ;;  %v3185_v35 = vld [vmem:[%s4330_s16] ss:$0 sm:$0xff] }
 0xfd9   : > { %v2454_v37 = vmul.f32 %v2453_v36, %v2453_v36 }
 0xfdb   : > { %v2455_v38 = vsel %vm647_vm1, %v2454_v37, 0.0 }
 0xfdc   : > { %2456 = vadd.xlane.f32.xlu1 %v2455_v38  ;;  %v3636_v38 = vld [vmem:[%s4331_s17 + $0x8] ss:$16 sps:$4 sm:$0xff]  }
0x1069   : > { %v2457_v48 = vpop.xlane.xlu1 %2456 }
0x106a   : > { %v2458_v49 = vmul.f32 0.015625, %v2457_v48  ;;  %v2724_v48 = vrot.slane %v2719_v46, %v2723_v45 }
0x106c   : > { %v2459_v50 = vadd.f32 1e-05, %v2458_v49  ;;  %v2728_v49 = vrot.slane %v2719_v46, %v2727_v47 }
0x106e   : > { %3664 = vrsqrt.f32 %v2459_v50 }
0x1078   : > { %v3665_v51 = vpop.eup %3664 }
0x1079   : > { %v2461_v53 = vmul.f32 %v3665_v51, %v2453_v36 }
0x107b   : > { %v2468_v55 = vmul.f32 %v3167_v52, %v2461_v53 }
0x107d   : > { %v2475_v56 = vadd.f32 %v3168_v54, %v2468_v55 }
0x107f   : > { %v2476_v57 = vpack.c.bf16 %v2475_v56, %v2475_v56 }
0x1081   : > { %3526 = vmatmul.mubr.msk.bf16.vlgmr.msra.gmra.mrb[36].mxu0 %vm647_vm1, %v2476_v57  ;;  %v2731_v57 = vsub.s32 2, %v3876_v28 }
0x1082   : > { %2825 = vmatpush1.bf16.msra.mxu0 %v3624_v18  ;;  %2856 = vmatprep.mubr.bf16.mxu0 %v3678_v25 }
0x1083   : > { %2826 = vmatprep.subr.bf16.mxu0 %v3629_v19  ;;  %v2732_v60 = vrot.slane %v2719_v46, %v2731_v57 }
0x1086   : > { %2827 = vmatpush1.bf16.msra.mxu0 %v3627_v20 }
0x1087   : > { %2828 = vmatprep.subr.bf16.mxu0 %v3632_v21 }
0x108a   : > { %2829 = vmatpush1.bf16.msra.mxu0 %v3630_v22 }
0x108b   : > { %2830 = vmatprep.subr.bf16.mxu0 %v3635_v23 }
0x108e   : > { %2831 = vmatpush1.bf16.msra.mxu0 %v3633_v24 }
0x108f   : > { %2865 = vmatprep.subr.bf16.mxu0 %v3638_v26 }
0x1154   : > { %v2553_v61 = vpop.f32.mrb[36].mxu0 }
0x1155   : > { %v2554_v62 = vadd.f32 %v3169_v58, %v2553_v61  ;;  %v3527_v63 = vpop.f32.mrb[37].mxu0  ;;  %v2736_v58 = vrot.slane %v2719_v46, %v2735_v59 }
0x1156   : > { %v2556_v0 = vpop.f32.mrb[38].mxu0 }
0x1157   : > { %v2559_v2 = vmax.f32 %v2554_v62, 0.0  ;;  %v3528_v3 = vpop.f32.mrb[39].mxu0 }
0x1159   : > { %v2560_v4 = vpack.c.bf16 %v2559_v2, %v2559_v2 }
0x115b   : > { %3546 = vmatmul.mubr.bf16.vlgmr.msra.gmra.mrb[48].mxu1 %v2560_v4 }
0x122e   : > { %v2666_v5 = vpop.f32.mrb[48].mxu1 }
0x122f   : > { %v2667_v6 = vadd.f32 %v3175_v1, %v2666_v5  ;;  %v3547_v7 = vpop.f32.mrb[49].mxu1 }
0x1230   : > { %v2669_v9 = vpop.f32.mrb[50].mxu1 }
0x1231   : > { %v3548_v11 = vpop.f32.mrb[51].mxu1  ;;  %v2672_v10 = vadd.f32 %v2667_v6, %v2475_v56 }
0x1233   : > { %v2675_v12 = vsel %vm647_vm1, %v2672_v10, 0.0 }
0x1234   : > { %2676 = vadd.xlane.f32.xlu0 %v2675_v12 }
0x12c1   : > { %v2677_v13 = vpop.xlane.xlu0 %2676 }
0x12c2   : > { %v2678_v29 = vmul.f32 0.015625, %v2677_v13 }
0x12c4   : > { %v2679_v14 = vsub.f32 %v2672_v10, %v2678_v29 }
0x12c6   : > { %v2680_v15 = vmul.f32 %v2679_v14, %v2679_v14 }
0x12c8   : > { %v2681_v16 = vsel %vm647_vm1, %v2680_v15, 0.0 }
0x12c9   : > { %2682 = vadd.xlane.f32.xlu1 %v2681_v16 }
0x1356   : > { %v2683_v27 = vpop.xlane.xlu1 %2682 }
0x1357   : > { %v2684_v30 = vmul.f32 0.015625, %v2683_v27 }
0x1359   : > { %v2685_v31 = vadd.f32 1e-05, %v2684_v30 }
0x135b   : > { %3666 = vrsqrt.f32 %v2685_v31 }
0x1365   : > { %v3667_v32 = vpop.eup %3666 }
0x1366   : > { %v2687_v34 = vmul.f32 %v3667_v32, %v2679_v14 }
0x1368   : > { %v2694_v36 = vmul.f32 %v3184_v33, %v2687_v34 }
0x136a   : > { %v2701_v37 = vadd.f32 %v3185_v35, %v2694_v36 }
0x136c   : > { %v2702_v39 = vpack.c.bf16 %v2701_v37, %v2701_v37 }
0x136e   : > { %3202 = vmatmul.mubr.msk.bf16.vlgmr.msra.gmra.mrb[40].mxu0 %vm647_vm1, %v2702_v39 }
0x136f   : > { %2866 = vmatpush1.bf16.msra.mxu0 %v3636_v38  ;;  %2897 = vmatprep.mubr.bf16.mxu0 %v3678_v25 }
0x1370   : > { %2867 = vmatprep.subr.bf16.mxu0 %v3641_v8 }
0x1373   : > { %2868 = vmatpush1.bf16.msra.mxu0 %v3639_v40 }
0x1374   : > { %2869 = vmatprep.subr.bf16.mxu0 %v3644_v41 }
0x1377   : > { %2870 = vmatpush1.bf16.msra.mxu0 %v3642_v42 }
0x1378   : > { %2871 = vmatprep.subr.bf16.mxu0 %v3647_v43 }
0x137b   : > { %2872 = vmatpush1.bf16.msra.mxu0 %v3645_v44 }
0x137e   : > { %3203 = vmatmul.mubr.msk.bf16.vlgmr.msra.gmra.mrb[44].mxu0 %vm647_vm1, %v2702_v39 }
0x1441   : > { %v2858_v50 = vpop.f32.mrb[40].mxu0 }
0x1442   : > { %v2859_v51 = vadd.f32 %v2858_v50, %v2724_v48  ;;  %v2860_v52 = vpop.f32.mrb[41].mxu0 }
0x1443   : > { %v2861_v53 = vadd.f32 %v2860_v52, %v2728_v49  ;;  %v2862_v54 = vpop.f32.mrb[42].mxu0 }
0x1444   : > { %v2863_v55 = vpop.f32.mrb[43].mxu0 }
0x1445   : > { %v3209_v56 = vpack.c.bf16 %v2861_v53, %v2859_v51 }
0x1447   : > { %2922 = vst [vmem:[%s599_s26] sm:$0xff] %v3209_v56 }
0x1451   : > { %v2899_v61 = vpop.f32.mrb[44].mxu0 }
0x1452   : > { %v2900_v62 = vadd.f32 %v2899_v61, %v2732_v60  ;;  %v2901_v63 = vpop.f32.mrb[45].mxu0 }
0x1453   : > { %v2902_v0 = vadd.f32 %v2901_v63, %v2736_v58  ;;  %v2903_v2 = vpop.f32.mrb[46].mxu0 }
0x1454   : > { %v2904_v3 = vpop.f32.mrb[47].mxu0 }
0x1455   : > { %v3210_v4 = vpack.c.bf16 %v2902_v0, %v2900_v62 }
0x1457   : > { %2923 = vst [vmem:[%s599_s26 + $0x8] sm:$0xff] %v3210_v4 }
0x1458 PF: > { %s29_s0 = sadd.s32 1, %s3674_s0  }
0x1459   : > { %p26_p4 = scmp.ge.s32.totalorder %s29_s0, 4  }
0x145b   :  { %28 = sbr.rel (!%p26_p4) target bundleno = 5 (0x5), region = 147 }

</bundles_post_ra>
